<compile_context>
chip_gen: v7x
topology: tpu7x:2x2x1
jax: 0.10.0
libtpu: 0.0.40
codegen_flags: <defaults>
</compile_context>

<pallas_src>
import jax
import jax.numpy as jnp
from jax import lax
from jax.experimental import pallas as pl
from jax.experimental.pallas import tpu as pltpu

INPUT_SIZE = 1
HIDDEN_SIZE = 10
OUTPUT_SIZE = 1
_SUB = 8  # timestep slab (sublane granule) for precompute / fc epilogue


def _tree_sum(vals):
    """Balanced binary-tree sum: dependence depth ceil(log2(n)) instead of n-1."""
    vals = list(vals)
    while len(vals) > 1:
        nxt = [vals[i] + vals[i + 1] for i in range(0, len(vals) - 1, 2)]
        if len(vals) % 2:
            nxt.append(vals[-1])
        vals = nxt
    return vals[0]


def rnn_fc_kernel(x_ref, wih_ref, whh_ref, bias_ref, wfc_ref, bfc_ref,
                  out_ref, hs_ref, whh_bc_ref, h_ref):
    """Fused Elman-RNN (tanh) + hoisted per-timestep Linear, one (batch-tile,
    seq-chunk) block per grid step.

    x_ref     : (Sc, Bt)     f32  time-major input chunk, batch on lanes
    wih_ref   : (H, 1)       f32
    whh_ref   : (H, H)       f32
    bias_ref  : (H, 1)       f32  b_ih + b_hh (pre-summed in wrapper)
    wfc_ref   : (H, 1)       f32  fc weight (transposed in wrapper)
    bfc_ref   : (1, 1)       f32
    out_ref   : (Sc, Bt)     f32  lane-dense output slab
    hs_ref    : (Sc, H, Bt)  f32  scratch: input terms, then hidden states
    whh_bc_ref: (H, H, Bt)   f32  scratch: lane-broadcast W_hh columns
    h_ref     : (H, Bt)      f32  scratch: hidden-state carry across chunks
    """
    Sc, Bt = x_ref.shape
    H = whh_ref.shape[0]
    n_slabs = Sc // _SUB

    # ---- per-batch-tile init: zero the hidden-state carry -------------------
    @pl.when(pl.program_id(1) == 0)
    def _():
        h_ref[...] = jnp.zeros_like(h_ref)

    # ---- preamble: lane-broadcast weights once (off the critical chain) -----
    whh = whh_ref[...]                                            # (H, H)
    for k in range(H):
        whh_bc_ref[k] = jnp.broadcast_to(whh[:, k:k + 1], (H, Bt))

    wih_bc = jnp.broadcast_to(wih_ref[...], (H, Bt))              # (H, Bt)
    bias_bc = jnp.broadcast_to(bias_ref[...], (H, Bt))            # (H, Bt)

    # ---- pass 1: precompute input term W_ih*x_t + b into hs_ref -------------
    # Independent across t -> fully pipelined, off the h->h dependence chain.
    def pre_body(t, carry):
        x_t = x_ref[pl.ds(t, 1), :]                               # (1, Bt)
        hs_ref[t] = wih_bc * x_t + bias_bc                        # (H, Bt)
        return carry

    lax.fori_loop(0, Sc, pre_body, 0, unroll=True if Sc <= 16 else 8)

    # ---- pass 2: serial recurrence (latency-bound h -> h chain) -------------
    def step(t, h):
        pre_t = hs_ref[t]                                         # (H, Bt)
        terms = [pre_t]
        for k in range(H):                                        # static unroll
            hk = jnp.broadcast_to(h[k:k + 1, :], (H, Bt))         # sublane bcast
            terms.append(whh_bc_ref[k] * hk)                      # independent
        h_new = jnp.tanh(_tree_sum(terms))                        # depth ~4 + EUP
        hs_ref[t] = h_new
        return h_new

    h_fin = lax.fori_loop(0, Sc, step, h_ref[...],
                          unroll=True if Sc <= 16 else 4)
    h_ref[...] = h_fin                                            # carry to next chunk

    # ---- pass 3: hoisted fc over 8-timestep slabs + dense stores ------------
    wfc_bc = jnp.broadcast_to(wfc_ref[...], (H, Bt))              # (H, Bt)
    bfc = bfc_ref[0, 0]

    def fc_body(i, carry):
        s0 = pl.multiple_of(i * _SUB, _SUB)
        hs_blk = hs_ref[pl.ds(s0, _SUB), :, :]                    # (_SUB, H, Bt)
        y_blk = jnp.sum(hs_blk * wfc_bc[None, :, :], axis=1) + bfc
        out_ref[pl.ds(s0, _SUB), :] = y_blk.astype(out_ref.dtype)
        return carry

    lax.fori_loop(0, n_slabs, fc_body, 0, unroll=True if n_slabs <= 8 else 4)


def net_forward(x, params, *, b_tile_cap=256, s_chunk_cap=256):
    """x: (B, S, 1) float32, batch_first (PyTorch convention)."""
    B, S, F = x.shape
    assert F == INPUT_SIZE
    H = HIDDEN_SIZE

    # layout plumbing in the wrapper (free in XLA): (B,S,1) -> (S,B)
    x_sb = jnp.transpose(x[:, :, 0], (1, 0)).astype(jnp.float32)

    lane = 128
    # NOTE(v7x): for B in (128, 256] two 128-lane tiles across both TensorCores
    # can beat one 256-lane tile; cap stays at 256 here (safe on v5e too).
    b_tile = min(pl.cdiv(B, lane) * lane, b_tile_cap)
    num_b = pl.cdiv(B, b_tile)
    B_pad = num_b * b_tile

    s_chunk = min(pl.cdiv(S, _SUB) * _SUB, s_chunk_cap)
    num_s = pl.cdiv(S, s_chunk)
    S_pad = num_s * s_chunk

    # zero-pad so every block (incl. output stores) is full / lane-dense
    x_pad = jnp.pad(x_sb, ((0, S_pad - S), (0, B_pad - B)))

    wih = params["wih"].astype(jnp.float32)                       # (H, 1)
    whh = params["whh"].astype(jnp.float32)                       # (H, H)
    bias = (params["bih"] + params["bhh"]).reshape(H, 1).astype(jnp.float32)
    wfc = params["wfc"].reshape(H, 1).astype(jnp.float32)         # (1,H)->(H,1)
    bfc = params["bfc"].reshape(1, 1).astype(jnp.float32)

    out_pad = pl.pallas_call(
        rnn_fc_kernel,
        out_shape=jax.ShapeDtypeStruct((S_pad, B_pad), jnp.float32),
        grid_spec=pltpu.PrefetchScalarGridSpec(
            num_scalar_prefetch=0,
            grid=(num_b, num_s),                                  # seq chunks innermost
            in_specs=[
                pl.BlockSpec((s_chunk, b_tile), lambda i, j: (j, i)),   # x
                pl.BlockSpec((H, 1), lambda i, j: (0, 0)),              # wih
                pl.BlockSpec((H, H), lambda i, j: (0, 0)),              # whh
                pl.BlockSpec((H, 1), lambda i, j: (0, 0)),              # bias
                pl.BlockSpec((H, 1), lambda i, j: (0, 0)),              # wfc
                pl.BlockSpec((1, 1), lambda i, j: (0, 0)),              # bfc
            ],
            out_specs=pl.BlockSpec((s_chunk, b_tile), lambda i, j: (j, i)),
            scratch_shapes=[
                pltpu.VMEM((s_chunk, H, b_tile), jnp.float32),    # hs / input terms
                pltpu.VMEM((H, H, b_tile), jnp.float32),          # lane-bcast W_hh cols
                pltpu.VMEM((H, b_tile), jnp.float32),             # h carry across chunks
            ],
        ),
        compiler_params=pltpu.CompilerParams(
            dimension_semantics=("parallel", "arbitrary"),
            vmem_limit_bytes=32 * 1024 * 1024,
        ),
    )(x_pad, wih, whh, bias, wfc, bfc)

    out = out_pad[:S, :B]                                         # strip padding
    # (S, B) -> (B, S, 1), matching the PyTorch output
    return jnp.transpose(out, (1, 0))[:, :, None]


def ref_forward(x, params):
    """Pure-JAX reference matching torch.nn.RNN(batch_first=True) + Linear."""
    B, S, _ = x.shape

    def step(h, x_t):
        h_new = jnp.tanh(x_t @ params["wih"].T + h @ params["whh"].T
                         + params["bih"] + params["bhh"])
        return h_new, h_new

    h0 = jnp.zeros((B, HIDDEN_SIZE), jnp.float32)
    _, hs = lax.scan(step, h0, jnp.transpose(x, (1, 0, 2)))       # (S, B, H)
    hs = jnp.transpose(hs, (1, 0, 2))                             # (B, S, H)
    y = hs.reshape(-1, HIDDEN_SIZE) @ params["wfc"].T + params["bfc"]
    return y.reshape(B, S, OUTPUT_SIZE)


def init_params(key):
    """Deterministic init mimicking net.initial_params(): N(0, 0.001) for RNN,
    small values for the fc layer."""
    k1, k2, k3, k4, k5, k6 = jax.random.split(key, 6)
    std = 0.001
    return {
        "wih": jax.random.normal(k1, (HIDDEN_SIZE, INPUT_SIZE), jnp.float32) * std,
        "whh": jax.random.normal(k2, (HIDDEN_SIZE, HIDDEN_SIZE), jnp.float32) * std,
        "bih": jax.random.normal(k3, (HIDDEN_SIZE,), jnp.float32) * std,
        "bhh": jax.random.normal(k4, (HIDDEN_SIZE,), jnp.float32) * std,
        "wfc": jax.random.normal(k5, (OUTPUT_SIZE, HIDDEN_SIZE), jnp.float32) * 0.1,
        "bfc": jax.random.normal(k6, (OUTPUT_SIZE,), jnp.float32) * 0.1,
    }


if __name__ == "__main__":
    key = jax.random.PRNGKey(0)
    kx, kx2, kp = jax.random.split(key, 3)
    params = init_params(kp)

    # primary small config (matches the data_prediction.py regression setting)
    B, S = 2, 8
    x = jax.random.normal(kx, (B, S, INPUT_SIZE), jnp.float32)
    out = jax.block_until_ready(net_forward(x, params))
    ref = ref_forward(x, params)
    assert out.shape == (B, S, OUTPUT_SIZE)
    assert jnp.allclose(out, ref, atol=1e-5, rtol=1e-5), (out, ref)

    # second config exercising S padding (S not a multiple of 8) and lane padding
    B2, S2 = 5, 21
    x2 = jax.random.normal(kx2, (B2, S2, INPUT_SIZE), jnp.float32)
    out2 = jax.block_until_ready(net_forward(x2, params))
    ref2 = ref_forward(x2, params)
    assert out2.shape == (B2, S2, OUTPUT_SIZE)
    assert jnp.allclose(out2, ref2, atol=1e-5, rtol=1e-5), (out2, ref2)

    print("KERNEL_OK")
</pallas_src>

<mosaic_0001>
module attributes {stable_mosaic.version = 11 : i64} {
  func.func @rnn_fc_kernel(%arg0: i32, %arg1: i32, %arg2: memref<8x128xf32, #tpu.memory_space<vmem>>, %arg3: memref<10x1xf32, #tpu.memory_space<vmem>>, %arg4: memref<10x10xf32, #tpu.memory_space<vmem>>, %arg5: memref<10x1xf32, #tpu.memory_space<vmem>>, %arg6: memref<10x1xf32, #tpu.memory_space<vmem>>, %arg7: memref<1x1xf32, #tpu.memory_space<vmem>>, %arg8: memref<8x128xf32, #tpu.memory_space<vmem>>, %arg9: memref<8x10x128xf32, #tpu.memory_space<vmem>>, %arg10: memref<10x10x128xf32, #tpu.memory_space<vmem>>, %arg11: memref<10x128xf32, #tpu.memory_space<vmem>>) attributes {dimension_semantics = [#tpu.dimension_semantics<parallel>, #tpu.dimension_semantics<arbitrary>], iteration_bounds = array<i64: 1, 1>, scalar_prefetch = 0 : i64, scratch_operands = 3 : i64, tpu.core_type = #tpu.core_type<tc>, window_params = [{transform_indices = @transform_0, window_bounds = array<i64: 8, 128>}, {pipeline_mode = #tpu.pipeline_mode<synchronous>, transform_indices = @transform_1, window_bounds = array<i64: 10, 1>}, {pipeline_mode = #tpu.pipeline_mode<synchronous>, transform_indices = @transform_2, window_bounds = array<i64: 10, 10>}, {pipeline_mode = #tpu.pipeline_mode<synchronous>, transform_indices = @transform_3, window_bounds = array<i64: 10, 1>}, {pipeline_mode = #tpu.pipeline_mode<synchronous>, transform_indices = @transform_4, window_bounds = array<i64: 10, 1>}, {pipeline_mode = #tpu.pipeline_mode<synchronous>, transform_indices = @transform_5, window_bounds = array<i64: 1, 1>}, {transform_indices = @transform_6, window_bounds = array<i64: 8, 128>}]} {
    %c0_i32 = arith.constant 0 : i32
    %0 = arith.cmpi eq, %arg1, %c0_i32 : i32
    %1 = arith.extui %0 : i1 to i32
    %c0_i32_0 = arith.constant 0 : i32
    %2 = arith.cmpi ne, %1, %c0_i32_0 : i32
    scf.if %2 {
      %cst_347 = arith.constant 0.000000e+00 : f32
      %785 = vector.broadcast %cst_347 : f32 to vector<10x128xf32>
      %c0_348 = arith.constant 0 : index
      %c0_349 = arith.constant 0 : index
      %786 = vector.load %arg11[%c0_348, %c0_349] : memref<10x128xf32, #tpu.memory_space<vmem>>, vector<10x128xf32>
      tpu.vector_store %arg11[%c0_348, %c0_349], %785 {strides = array<i32>} : memref<10x128xf32, #tpu.memory_space<vmem>>, vector<10x128xf32>,
    } else {
    }
    %c0 = arith.constant 0 : index
    %c0_1 = arith.constant 0 : index
    %3 = vector.load %arg4[%c0, %c0_1] : memref<10x10xf32, #tpu.memory_space<vmem>>, vector<10x10xf32>
    %4 = vector.extract_strided_slice %3 {offsets = [0, 0], sizes = [10, 1], strides = [1, 1]} : vector<10x10xf32> to vector<10x1xf32>
    %5 = vector.shape_cast %4 : vector<10x1xf32> to vector<10x1xf32>
    %6 = vector.broadcast %5 : vector<10x1xf32> to vector<10x128xf32>
    %c0_2 = arith.constant 0 : index
    %c0_3 = arith.constant 0 : index
    %c0_4 = arith.constant 0 : index
    %7 = vector.load %arg10[%c0_2, %c0_3, %c0_4] : memref<10x10x128xf32, #tpu.memory_space<vmem>>, vector<1x10x128xf32>
    %8 = vector.shape_cast %7 : vector<1x10x128xf32> to vector<10x128xf32>
    %9 = vector.shape_cast %6 : vector<10x128xf32> to vector<1x10x128xf32>
    tpu.vector_store %arg10[%c0_2, %c0_3, %c0_4], %9 {strides = array<i32>} : memref<10x10x128xf32, #tpu.memory_space<vmem>>, vector<1x10x128xf32>,
    %10 = vector.extract_strided_slice %3 {offsets = [0, 1], sizes = [10, 1], strides = [1, 1]} : vector<10x10xf32> to vector<10x1xf32>
    %11 = vector.shape_cast %10 : vector<10x1xf32> to vector<10x1xf32>
    %12 = vector.broadcast %11 : vector<10x1xf32> to vector<10x128xf32>
    %c1 = arith.constant 1 : index
    %c0_5 = arith.constant 0 : index
    %c0_6 = arith.constant 0 : index
    %13 = vector.load %arg10[%c1, %c0_5, %c0_6] : memref<10x10x128xf32, #tpu.memory_space<vmem>>, vector<1x10x128xf32>
    %14 = vector.shape_cast %13 : vector<1x10x128xf32> to vector<10x128xf32>
    %15 = vector.shape_cast %12 : vector<10x128xf32> to vector<1x10x128xf32>
    tpu.vector_store %arg10[%c1, %c0_5, %c0_6], %15 {strides = array<i32>} : memref<10x10x128xf32, #tpu.memory_space<vmem>>, vector<1x10x128xf32>,
    %16 = vector.extract_strided_slice %3 {offsets = [0, 2], sizes = [10, 1], strides = [1, 1]} : vector<10x10xf32> to vector<10x1xf32>
    %17 = vector.shape_cast %16 : vector<10x1xf32> to vector<10x1xf32>
    %18 = vector.broadcast %17 : vector<10x1xf32> to vector<10x128xf32>
    %c2 = arith.constant 2 : index
    %c0_7 = arith.constant 0 : index
    %c0_8 = arith.constant 0 : index
    %19 = vector.load %arg10[%c2, %c0_7, %c0_8] : memref<10x10x128xf32, #tpu.memory_space<vmem>>, vector<1x10x128xf32>
    %20 = vector.shape_cast %19 : vector<1x10x128xf32> to vector<10x128xf32>
    %21 = vector.shape_cast %18 : vector<10x128xf32> to vector<1x10x128xf32>
    tpu.vector_store %arg10[%c2, %c0_7, %c0_8], %21 {strides = array<i32>} : memref<10x10x128xf32, #tpu.memory_space<vmem>>, vector<1x10x128xf32>,
    %22 = vector.extract_strided_slice %3 {offsets = [0, 3], sizes = [10, 1], strides = [1, 1]} : vector<10x10xf32> to vector<10x1xf32>
    %23 = vector.shape_cast %22 : vector<10x1xf32> to vector<10x1xf32>
    %24 = vector.broadcast %23 : vector<10x1xf32> to vector<10x128xf32>
    %c3 = arith.constant 3 : index
    %c0_9 = arith.constant 0 : index
    %c0_10 = arith.constant 0 : index
    %25 = vector.load %arg10[%c3, %c0_9, %c0_10] : memref<10x10x128xf32, #tpu.memory_space<vmem>>, vector<1x10x128xf32>
    %26 = vector.shape_cast %25 : vector<1x10x128xf32> to vector<10x128xf32>
    %27 = vector.shape_cast %24 : vector<10x128xf32> to vector<1x10x128xf32>
    tpu.vector_store %arg10[%c3, %c0_9, %c0_10], %27 {strides = array<i32>} : memref<10x10x128xf32, #tpu.memory_space<vmem>>, vector<1x10x128xf32>,
    %28 = vector.extract_strided_slice %3 {offsets = [0, 4], sizes = [10, 1], strides = [1, 1]} : vector<10x10xf32> to vector<10x1xf32>
    %29 = vector.shape_cast %28 : vector<10x1xf32> to vector<10x1xf32>
    %30 = vector.broadcast %29 : vector<10x1xf32> to vector<10x128xf32>
    %c4 = arith.constant 4 : index
    %c0_11 = arith.constant 0 : index
    %c0_12 = arith.constant 0 : index
    %31 = vector.load %arg10[%c4, %c0_11, %c0_12] : memref<10x10x128xf32, #tpu.memory_space<vmem>>, vector<1x10x128xf32>
    %32 = vector.shape_cast %31 : vector<1x10x128xf32> to vector<10x128xf32>
    %33 = vector.shape_cast %30 : vector<10x128xf32> to vector<1x10x128xf32>
    tpu.vector_store %arg10[%c4, %c0_11, %c0_12], %33 {strides = array<i32>} : memref<10x10x128xf32, #tpu.memory_space<vmem>>, vector<1x10x128xf32>,
    %34 = vector.extract_strided_slice %3 {offsets = [0, 5], sizes = [10, 1], strides = [1, 1]} : vector<10x10xf32> to vector<10x1xf32>
    %35 = vector.shape_cast %34 : vector<10x1xf32> to vector<10x1xf32>
    %36 = vector.broadcast %35 : vector<10x1xf32> to vector<10x128xf32>
    %c5 = arith.constant 5 : index
    %c0_13 = arith.constant 0 : index
    %c0_14 = arith.constant 0 : index
    %37 = vector.load %arg10[%c5, %c0_13, %c0_14] : memref<10x10x128xf32, #tpu.memory_space<vmem>>, vector<1x10x128xf32>
    %38 = vector.shape_cast %37 : vector<1x10x128xf32> to vector<10x128xf32>
    %39 = vector.shape_cast %36 : vector<10x128xf32> to vector<1x10x128xf32>
    tpu.vector_store %arg10[%c5, %c0_13, %c0_14], %39 {strides = array<i32>} : memref<10x10x128xf32, #tpu.memory_space<vmem>>, vector<1x10x128xf32>,
    %40 = vector.extract_strided_slice %3 {offsets = [0, 6], sizes = [10, 1], strides = [1, 1]} : vector<10x10xf32> to vector<10x1xf32>
    %41 = vector.shape_cast %40 : vector<10x1xf32> to vector<10x1xf32>
    %42 = vector.broadcast %41 : vector<10x1xf32> to vector<10x128xf32>
    %c6 = arith.constant 6 : index
    %c0_15 = arith.constant 0 : index
    %c0_16 = arith.constant 0 : index
    %43 = vector.load %arg10[%c6, %c0_15, %c0_16] : memref<10x10x128xf32, #tpu.memory_space<vmem>>, vector<1x10x128xf32>
    %44 = vector.shape_cast %43 : vector<1x10x128xf32> to vector<10x128xf32>
    %45 = vector.shape_cast %42 : vector<10x128xf32> to vector<1x10x128xf32>
    tpu.vector_store %arg10[%c6, %c0_15, %c0_16], %45 {strides = array<i32>} : memref<10x10x128xf32, #tpu.memory_space<vmem>>, vector<1x10x128xf32>,
    %46 = vector.extract_strided_slice %3 {offsets = [0, 7], sizes = [10, 1], strides = [1, 1]} : vector<10x10xf32> to vector<10x1xf32>
    %47 = vector.shape_cast %46 : vector<10x1xf32> to vector<10x1xf32>
    %48 = vector.broadcast %47 : vector<10x1xf32> to vector<10x128xf32>
    %c7 = arith.constant 7 : index
    %c0_17 = arith.constant 0 : index
    %c0_18 = arith.constant 0 : index
    %49 = vector.load %arg10[%c7, %c0_17, %c0_18] : memref<10x10x128xf32, #tpu.memory_space<vmem>>, vector<1x10x128xf32>
    %50 = vector.shape_cast %49 : vector<1x10x128xf32> to vector<10x128xf32>
    %51 = vector.shape_cast %48 : vector<10x128xf32> to vector<1x10x128xf32>
    tpu.vector_store %arg10[%c7, %c0_17, %c0_18], %51 {strides = array<i32>} : memref<10x10x128xf32, #tpu.memory_space<vmem>>, vector<1x10x128xf32>,
    %52 = vector.extract_strided_slice %3 {offsets = [0, 8], sizes = [10, 1], strides = [1, 1]} : vector<10x10xf32> to vector<10x1xf32>
    %53 = vector.shape_cast %52 : vector<10x1xf32> to vector<10x1xf32>
    %54 = vector.broadcast %53 : vector<10x1xf32> to vector<10x128xf32>
    %c8 = arith.constant 8 : index
    %c0_19 = arith.constant 0 : index
    %c0_20 = arith.constant 0 : index
    %55 = vector.load %arg10[%c8, %c0_19, %c0_20] : memref<10x10x128xf32, #tpu.memory_space<vmem>>, vector<1x10x128xf32>
    %56 = vector.shape_cast %55 : vector<1x10x128xf32> to vector<10x128xf32>
    %57 = vector.shape_cast %54 : vector<10x128xf32> to vector<1x10x128xf32>
    tpu.vector_store %arg10[%c8, %c0_19, %c0_20], %57 {strides = array<i32>} : memref<10x10x128xf32, #tpu.memory_space<vmem>>, vector<1x10x128xf32>,
    %58 = vector.extract_strided_slice %3 {offsets = [0, 9], sizes = [10, 1], strides = [1, 1]} : vector<10x10xf32> to vector<10x1xf32>
    %59 = vector.shape_cast %58 : vector<10x1xf32> to vector<10x1xf32>
    %60 = vector.broadcast %59 : vector<10x1xf32> to vector<10x128xf32>
    %c9 = arith.constant 9 : index
    %c0_21 = arith.constant 0 : index
    %c0_22 = arith.constant 0 : index
    %61 = vector.load %arg10[%c9, %c0_21, %c0_22] : memref<10x10x128xf32, #tpu.memory_space<vmem>>, vector<1x10x128xf32>
    %62 = vector.shape_cast %61 : vector<1x10x128xf32> to vector<10x128xf32>
    %63 = vector.shape_cast %60 : vector<10x128xf32> to vector<1x10x128xf32>
    tpu.vector_store %arg10[%c9, %c0_21, %c0_22], %63 {strides = array<i32>} : memref<10x10x128xf32, #tpu.memory_space<vmem>>, vector<1x10x128xf32>,
    %c0_23 = arith.constant 0 : index
    %c0_24 = arith.constant 0 : index
    %64 = vector.load %arg3[%c0_23, %c0_24] : memref<10x1xf32, #tpu.memory_space<vmem>>, vector<10x1xf32>
    %65 = vector.shape_cast %64 : vector<10x1xf32> to vector<10x1xf32>
    %66 = vector.broadcast %65 : vector<10x1xf32> to vector<10x128xf32>
    %c0_25 = arith.constant 0 : index
    %c0_26 = arith.constant 0 : index
    %67 = vector.load %arg5[%c0_25, %c0_26] : memref<10x1xf32, #tpu.memory_space<vmem>>, vector<10x1xf32>
    %68 = vector.shape_cast %67 : vector<10x1xf32> to vector<10x1xf32>
    %69 = vector.broadcast %68 : vector<10x1xf32> to vector<10x128xf32>
    %c0_i32_27 = arith.constant 0 : i32
    %70 = arith.index_cast %c0_i32_27 : i32 to index
    %c0_28 = arith.constant 0 : index
    %71 = vector.load %arg2[%70, %c0_28] : memref<8x128xf32, #tpu.memory_space<vmem>>, vector<1x128xf32>
    %72 = vector.broadcast %71 : vector<1x128xf32> to vector<10x128xf32>
    %73 = arith.mulf %66, %72 : vector<10x128xf32>
    %74 = arith.addf %73, %69 : vector<10x128xf32>
    %75 = arith.index_cast %c0_i32_27 : i32 to index
    %c0_29 = arith.constant 0 : index
    %c0_30 = arith.constant 0 : index
    %76 = vector.load %arg9[%75, %c0_29, %c0_30] : memref<8x10x128xf32, #tpu.memory_space<vmem>>, vector<1x10x128xf32>
    %77 = vector.shape_cast %76 : vector<1x10x128xf32> to vector<10x128xf32>
    %78 = vector.shape_cast %74 : vector<10x128xf32> to vector<1x10x128xf32>
    tpu.vector_store %arg9[%75, %c0_29, %c0_30], %78 {strides = array<i32>} : memref<8x10x128xf32, #tpu.memory_space<vmem>>, vector<1x10x128xf32>,
    %c1_i32 = arith.constant 1 : i32
    %79 = arith.index_cast %c1_i32 : i32 to index
    %c0_31 = arith.constant 0 : index
    %80 = vector.load %arg2[%79, %c0_31] : memref<8x128xf32, #tpu.memory_space<vmem>>, vector<1x128xf32>
    %81 = vector.broadcast %80 : vector<1x128xf32> to vector<10x128xf32>
    %82 = arith.mulf %66, %81 : vector<10x128xf32>
    %83 = arith.addf %82, %69 : vector<10x128xf32>
    %84 = arith.index_cast %c1_i32 : i32 to index
    %c0_32 = arith.constant 0 : index
    %c0_33 = arith.constant 0 : index
    %85 = vector.load %arg9[%84, %c0_32, %c0_33] : memref<8x10x128xf32, #tpu.memory_space<vmem>>, vector<1x10x128xf32>
    %86 = vector.shape_cast %85 : vector<1x10x128xf32> to vector<10x128xf32>
    %87 = vector.shape_cast %83 : vector<10x128xf32> to vector<1x10x128xf32>
    tpu.vector_store %arg9[%84, %c0_32, %c0_33], %87 {strides = array<i32>} : memref<8x10x128xf32, #tpu.memory_space<vmem>>, vector<1x10x128xf32>,
    %c2_i32 = arith.constant 2 : i32
    %88 = arith.index_cast %c2_i32 : i32 to index
    %c0_34 = arith.constant 0 : index
    %89 = vector.load %arg2[%88, %c0_34] : memref<8x128xf32, #tpu.memory_space<vmem>>, vector<1x128xf32>
    %90 = vector.broadcast %89 : vector<1x128xf32> to vector<10x128xf32>
    %91 = arith.mulf %66, %90 : vector<10x128xf32>
    %92 = arith.addf %91, %69 : vector<10x128xf32>
    %93 = arith.index_cast %c2_i32 : i32 to index
    %c0_35 = arith.constant 0 : index
    %c0_36 = arith.constant 0 : index
    %94 = vector.load %arg9[%93, %c0_35, %c0_36] : memref<8x10x128xf32, #tpu.memory_space<vmem>>, vector<1x10x128xf32>
    %95 = vector.shape_cast %94 : vector<1x10x128xf32> to vector<10x128xf32>
    %96 = vector.shape_cast %92 : vector<10x128xf32> to vector<1x10x128xf32>
    tpu.vector_store %arg9[%93, %c0_35, %c0_36], %96 {strides = array<i32>} : memref<8x10x128xf32, #tpu.memory_space<vmem>>, vector<1x10x128xf32>,
    %c3_i32 = arith.constant 3 : i32
    %97 = arith.index_cast %c3_i32 : i32 to index
    %c0_37 = arith.constant 0 : index
    %98 = vector.load %arg2[%97, %c0_37] : memref<8x128xf32, #tpu.memory_space<vmem>>, vector<1x128xf32>
    %99 = vector.broadcast %98 : vector<1x128xf32> to vector<10x128xf32>
    %100 = arith.mulf %66, %99 : vector<10x128xf32>
    %101 = arith.addf %100, %69 : vector<10x128xf32>
    %102 = arith.index_cast %c3_i32 : i32 to index
    %c0_38 = arith.constant 0 : index
    %c0_39 = arith.constant 0 : index
    %103 = vector.load %arg9[%102, %c0_38, %c0_39] : memref<8x10x128xf32, #tpu.memory_space<vmem>>, vector<1x10x128xf32>
    %104 = vector.shape_cast %103 : vector<1x10x128xf32> to vector<10x128xf32>
    %105 = vector.shape_cast %101 : vector<10x128xf32> to vector<1x10x128xf32>
    tpu.vector_store %arg9[%102, %c0_38, %c0_39], %105 {strides = array<i32>} : memref<8x10x128xf32, #tpu.memory_space<vmem>>, vector<1x10x128xf32>,
    %c4_i32 = arith.constant 4 : i32
    %106 = arith.index_cast %c4_i32 : i32 to index
    %c0_40 = arith.constant 0 : index
    %107 = vector.load %arg2[%106, %c0_40] : memref<8x128xf32, #tpu.memory_space<vmem>>, vector<1x128xf32>
    %108 = vector.broadcast %107 : vector<1x128xf32> to vector<10x128xf32>
    %109 = arith.mulf %66, %108 : vector<10x128xf32>
    %110 = arith.addf %109, %69 : vector<10x128xf32>
    %111 = arith.index_cast %c4_i32 : i32 to index
    %c0_41 = arith.constant 0 : index
    %c0_42 = arith.constant 0 : index
    %112 = vector.load %arg9[%111, %c0_41, %c0_42] : memref<8x10x128xf32, #tpu.memory_space<vmem>>, vector<1x10x128xf32>
    %113 = vector.shape_cast %112 : vector<1x10x128xf32> to vector<10x128xf32>
    %114 = vector.shape_cast %110 : vector<10x128xf32> to vector<1x10x128xf32>
    tpu.vector_store %arg9[%111, %c0_41, %c0_42], %114 {strides = array<i32>} : memref<8x10x128xf32, #tpu.memory_space<vmem>>, vector<1x10x128xf32>,
    %c5_i32 = arith.constant 5 : i32
    %115 = arith.index_cast %c5_i32 : i32 to index
    %c0_43 = arith.constant 0 : index
    %116 = vector.load %arg2[%115, %c0_43] : memref<8x128xf32, #tpu.memory_space<vmem>>, vector<1x128xf32>
    %117 = vector.broadcast %116 : vector<1x128xf32> to vector<10x128xf32>
    %118 = arith.mulf %66, %117 : vector<10x128xf32>
    %119 = arith.addf %118, %69 : vector<10x128xf32>
    %120 = arith.index_cast %c5_i32 : i32 to index
    %c0_44 = arith.constant 0 : index
    %c0_45 = arith.constant 0 : index
    %121 = vector.load %arg9[%120, %c0_44, %c0_45] : memref<8x10x128xf32, #tpu.memory_space<vmem>>, vector<1x10x128xf32>
    %122 = vector.shape_cast %121 : vector<1x10x128xf32> to vector<10x128xf32>
    %123 = vector.shape_cast %119 : vector<10x128xf32> to vector<1x10x128xf32>
    tpu.vector_store %arg9[%120, %c0_44, %c0_45], %123 {strides = array<i32>} : memref<8x10x128xf32, #tpu.memory_space<vmem>>, vector<1x10x128xf32>,
    %c6_i32 = arith.constant 6 : i32
    %124 = arith.index_cast %c6_i32 : i32 to index
    %c0_46 = arith.constant 0 : index
    %125 = vector.load %arg2[%124, %c0_46] : memref<8x128xf32, #tpu.memory_space<vmem>>, vector<1x128xf32>
    %126 = vector.broadcast %125 : vector<1x128xf32> to vector<10x128xf32>
    %127 = arith.mulf %66, %126 : vector<10x128xf32>
    %128 = arith.addf %127, %69 : vector<10x128xf32>
    %129 = arith.index_cast %c6_i32 : i32 to index
    %c0_47 = arith.constant 0 : index
    %c0_48 = arith.constant 0 : index
    %130 = vector.load %arg9[%129, %c0_47, %c0_48] : memref<8x10x128xf32, #tpu.memory_space<vmem>>, vector<1x10x128xf32>
    %131 = vector.shape_cast %130 : vector<1x10x128xf32> to vector<10x128xf32>
    %132 = vector.shape_cast %128 : vector<10x128xf32> to vector<1x10x128xf32>
    tpu.vector_store %arg9[%129, %c0_47, %c0_48], %132 {strides = array<i32>} : memref<8x10x128xf32, #tpu.memory_space<vmem>>, vector<1x10x128xf32>,
    %c7_i32 = arith.constant 7 : i32
    %133 = arith.index_cast %c7_i32 : i32 to index
    %c0_49 = arith.constant 0 : index
    %134 = vector.load %arg2[%133, %c0_49] : memref<8x128xf32, #tpu.memory_space<vmem>>, vector<1x128xf32>
    %135 = vector.broadcast %134 : vector<1x128xf32> to vector<10x128xf32>
    %136 = arith.mulf %66, %135 : vector<10x128xf32>
    %137 = arith.addf %136, %69 : vector<10x128xf32>
    %138 = arith.index_cast %c7_i32 : i32 to index
    %c0_50 = arith.constant 0 : index
    %c0_51 = arith.constant 0 : index
    %139 = vector.load %arg9[%138, %c0_50, %c0_51] : memref<8x10x128xf32, #tpu.memory_space<vmem>>, vector<1x10x128xf32>
    %140 = vector.shape_cast %139 : vector<1x10x128xf32> to vector<10x128xf32>
    %141 = vector.shape_cast %137 : vector<10x128xf32> to vector<1x10x128xf32>
    tpu.vector_store %arg9[%138, %c0_50, %c0_51], %141 {strides = array<i32>} : memref<8x10x128xf32, #tpu.memory_space<vmem>>, vector<1x10x128xf32>,
    %c8_i32 = arith.constant 8 : i32
    %c0_52 = arith.constant 0 : index
    %c0_53 = arith.constant 0 : index
    %142 = vector.load %arg11[%c0_52, %c0_53] : memref<10x128xf32, #tpu.memory_space<vmem>>, vector<10x128xf32>
    %c0_i32_54 = arith.constant 0 : i32
    %143 = arith.index_cast %c0_i32_54 : i32 to index
    %c0_55 = arith.constant 0 : index
    %c0_56 = arith.constant 0 : index
    %144 = vector.load %arg9[%143, %c0_55, %c0_56] : memref<8x10x128xf32, #tpu.memory_space<vmem>>, vector<1x10x128xf32>
    %145 = vector.shape_cast %144 : vector<1x10x128xf32> to vector<10x128xf32>
    %146 = vector.extract_strided_slice %142 {offsets = [0, 0], sizes = [1, 128], strides = [1, 1]} : vector<10x128xf32> to vector<1x128xf32>
    %147 = vector.shape_cast %146 : vector<1x128xf32> to vector<1x128xf32>
    %148 = vector.broadcast %147 : vector<1x128xf32> to vector<10x128xf32>
    %c0_57 = arith.constant 0 : index
    %c0_58 = arith.constant 0 : index
    %c0_59 = arith.constant 0 : index
    %149 = vector.load %arg10[%c0_57, %c0_58, %c0_59] : memref<10x10x128xf32, #tpu.memory_space<vmem>>, vector<1x10x128xf32>
    %150 = vector.shape_cast %149 : vector<1x10x128xf32> to vector<10x128xf32>
    %151 = arith.mulf %150, %148 : vector<10x128xf32>
    %152 = vector.extract_strided_slice %142 {offsets = [1, 0], sizes = [1, 128], strides = [1, 1]} : vector<10x128xf32> to vector<1x128xf32>
    %153 = vector.shape_cast %152 : vector<1x128xf32> to vector<1x128xf32>
    %154 = vector.broadcast %153 : vector<1x128xf32> to vector<10x128xf32>
    %c1_60 = arith.constant 1 : index
    %c0_61 = arith.constant 0 : index
    %c0_62 = arith.constant 0 : index
    %155 = vector.load %arg10[%c1_60, %c0_61, %c0_62] : memref<10x10x128xf32, #tpu.memory_space<vmem>>, vector<1x10x128xf32>
    %156 = vector.shape_cast %155 : vector<1x10x128xf32> to vector<10x128xf32>
    %157 = arith.mulf %156, %154 : vector<10x128xf32>
    %158 = vector.extract_strided_slice %142 {offsets = [2, 0], sizes = [1, 128], strides = [1, 1]} : vector<10x128xf32> to vector<1x128xf32>
    %159 = vector.shape_cast %158 : vector<1x128xf32> to vector<1x128xf32>
    %160 = vector.broadcast %159 : vector<1x128xf32> to vector<10x128xf32>
    %c2_63 = arith.constant 2 : index
    %c0_64 = arith.constant 0 : index
    %c0_65 = arith.constant 0 : index
    %161 = vector.load %arg10[%c2_63, %c0_64, %c0_65] : memref<10x10x128xf32, #tpu.memory_space<vmem>>, vector<1x10x128xf32>
    %162 = vector.shape_cast %161 : vector<1x10x128xf32> to vector<10x128xf32>
    %163 = arith.mulf %162, %160 : vector<10x128xf32>
    %164 = vector.extract_strided_slice %142 {offsets = [3, 0], sizes = [1, 128], strides = [1, 1]} : vector<10x128xf32> to vector<1x128xf32>
    %165 = vector.shape_cast %164 : vector<1x128xf32> to vector<1x128xf32>
    %166 = vector.broadcast %165 : vector<1x128xf32> to vector<10x128xf32>
    %c3_66 = arith.constant 3 : index
    %c0_67 = arith.constant 0 : index
    %c0_68 = arith.constant 0 : index
    %167 = vector.load %arg10[%c3_66, %c0_67, %c0_68] : memref<10x10x128xf32, #tpu.memory_space<vmem>>, vector<1x10x128xf32>
    %168 = vector.shape_cast %167 : vector<1x10x128xf32> to vector<10x128xf32>
    %169 = arith.mulf %168, %166 : vector<10x128xf32>
    %170 = vector.extract_strided_slice %142 {offsets = [4, 0], sizes = [1, 128], strides = [1, 1]} : vector<10x128xf32> to vector<1x128xf32>
    %171 = vector.shape_cast %170 : vector<1x128xf32> to vector<1x128xf32>
    %172 = vector.broadcast %171 : vector<1x128xf32> to vector<10x128xf32>
    %c4_69 = arith.constant 4 : index
    %c0_70 = arith.constant 0 : index
    %c0_71 = arith.constant 0 : index
    %173 = vector.load %arg10[%c4_69, %c0_70, %c0_71] : memref<10x10x128xf32, #tpu.memory_space<vmem>>, vector<1x10x128xf32>
    %174 = vector.shape_cast %173 : vector<1x10x128xf32> to vector<10x128xf32>
    %175 = arith.mulf %174, %172 : vector<10x128xf32>
    %176 = vector.extract_strided_slice %142 {offsets = [5, 0], sizes = [1, 128], strides = [1, 1]} : vector<10x128xf32> to vector<1x128xf32>
    %177 = vector.shape_cast %176 : vector<1x128xf32> to vector<1x128xf32>
    %178 = vector.broadcast %177 : vector<1x128xf32> to vector<10x128xf32>
    %c5_72 = arith.constant 5 : index
    %c0_73 = arith.constant 0 : index
    %c0_74 = arith.constant 0 : index
    %179 = vector.load %arg10[%c5_72, %c0_73, %c0_74] : memref<10x10x128xf32, #tpu.memory_space<vmem>>, vector<1x10x128xf32>
    %180 = vector.shape_cast %179 : vector<1x10x128xf32> to vector<10x128xf32>
    %181 = arith.mulf %180, %178 : vector<10x128xf32>
    %182 = vector.extract_strided_slice %142 {offsets = [6, 0], sizes = [1, 128], strides = [1, 1]} : vector<10x128xf32> to vector<1x128xf32>
    %183 = vector.shape_cast %182 : vector<1x128xf32> to vector<1x128xf32>
    %184 = vector.broadcast %183 : vector<1x128xf32> to vector<10x128xf32>
    %c6_75 = arith.constant 6 : index
    %c0_76 = arith.constant 0 : index
    %c0_77 = arith.constant 0 : index
    %185 = vector.load %arg10[%c6_75, %c0_76, %c0_77] : memref<10x10x128xf32, #tpu.memory_space<vmem>>, vector<1x10x128xf32>
    %186 = vector.shape_cast %185 : vector<1x10x128xf32> to vector<10x128xf32>
    %187 = arith.mulf %186, %184 : vector<10x128xf32>
    %188 = vector.extract_strided_slice %142 {offsets = [7, 0], sizes = [1, 128], strides = [1, 1]} : vector<10x128xf32> to vector<1x128xf32>
    %189 = vector.shape_cast %188 : vector<1x128xf32> to vector<1x128xf32>
    %190 = vector.broadcast %189 : vector<1x128xf32> to vector<10x128xf32>
    %c7_78 = arith.constant 7 : index
    %c0_79 = arith.constant 0 : index
    %c0_80 = arith.constant 0 : index
    %191 = vector.load %arg10[%c7_78, %c0_79, %c0_80] : memref<10x10x128xf32, #tpu.memory_space<vmem>>, vector<1x10x128xf32>
    %192 = vector.shape_cast %191 : vector<1x10x128xf32> to vector<10x128xf32>
    %193 = arith.mulf %192, %190 : vector<10x128xf32>
    %194 = vector.extract_strided_slice %142 {offsets = [8, 0], sizes = [1, 128], strides = [1, 1]} : vector<10x128xf32> to vector<1x128xf32>
    %195 = vector.shape_cast %194 : vector<1x128xf32> to vector<1x128xf32>
    %196 = vector.broadcast %195 : vector<1x128xf32> to vector<10x128xf32>
    %c8_81 = arith.constant 8 : index
    %c0_82 = arith.constant 0 : index
    %c0_83 = arith.constant 0 : index
    %197 = vector.load %arg10[%c8_81, %c0_82, %c0_83] : memref<10x10x128xf32, #tpu.memory_space<vmem>>, vector<1x10x128xf32>
    %198 = vector.shape_cast %197 : vector<1x10x128xf32> to vector<10x128xf32>
    %199 = arith.mulf %198, %196 : vector<10x128xf32>
    %200 = vector.extract_strided_slice %142 {offsets = [9, 0], sizes = [1, 128], strides = [1, 1]} : vector<10x128xf32> to vector<1x128xf32>
    %201 = vector.shape_cast %200 : vector<1x128xf32> to vector<1x128xf32>
    %202 = vector.broadcast %201 : vector<1x128xf32> to vector<10x128xf32>
    %c9_84 = arith.constant 9 : index
    %c0_85 = arith.constant 0 : index
    %c0_86 = arith.constant 0 : index
    %203 = vector.load %arg10[%c9_84, %c0_85, %c0_86] : memref<10x10x128xf32, #tpu.memory_space<vmem>>, vector<1x10x128xf32>
    %204 = vector.shape_cast %203 : vector<1x10x128xf32> to vector<10x128xf32>
    %205 = arith.mulf %204, %202 : vector<10x128xf32>
    %206 = arith.addf %145, %151 : vector<10x128xf32>
    %207 = arith.addf %157, %163 : vector<10x128xf32>
    %208 = arith.addf %169, %175 : vector<10x128xf32>
    %209 = arith.addf %181, %187 : vector<10x128xf32>
    %210 = arith.addf %193, %199 : vector<10x128xf32>
    %211 = arith.addf %206, %207 : vector<10x128xf32>
    %212 = arith.addf %208, %209 : vector<10x128xf32>
    %213 = arith.addf %210, %205 : vector<10x128xf32>
    %214 = arith.addf %211, %212 : vector<10x128xf32>
    %215 = arith.addf %214, %213 : vector<10x128xf32>
    %216 = math.tanh %215 : vector<10x128xf32>
    %217 = arith.index_cast %c0_i32_54 : i32 to index
    %c0_87 = arith.constant 0 : index
    %c0_88 = arith.constant 0 : index
    %218 = vector.load %arg9[%217, %c0_87, %c0_88] : memref<8x10x128xf32, #tpu.memory_space<vmem>>, vector<1x10x128xf32>
    %219 = vector.shape_cast %218 : vector<1x10x128xf32> to vector<10x128xf32>
    %220 = vector.shape_cast %216 : vector<10x128xf32> to vector<1x10x128xf32>
    tpu.vector_store %arg9[%217, %c0_87, %c0_88], %220 {strides = array<i32>} : memref<8x10x128xf32, #tpu.memory_space<vmem>>, vector<1x10x128xf32>,
    %c1_i32_89 = arith.constant 1 : i32
    %221 = arith.index_cast %c1_i32_89 : i32 to index
    %c0_90 = arith.constant 0 : index
    %c0_91 = arith.constant 0 : index
    %222 = vector.load %arg9[%221, %c0_90, %c0_91] : memref<8x10x128xf32, #tpu.memory_space<vmem>>, vector<1x10x128xf32>
    %223 = vector.shape_cast %222 : vector<1x10x128xf32> to vector<10x128xf32>
    %224 = vector.extract_strided_slice %216 {offsets = [0, 0], sizes = [1, 128], strides = [1, 1]} : vector<10x128xf32> to vector<1x128xf32>
    %225 = vector.shape_cast %224 : vector<1x128xf32> to vector<1x128xf32>
    %226 = vector.broadcast %225 : vector<1x128xf32> to vector<10x128xf32>
    %c0_92 = arith.constant 0 : index
    %c0_93 = arith.constant 0 : index
    %c0_94 = arith.constant 0 : index
    %227 = vector.load %arg10[%c0_92, %c0_93, %c0_94] : memref<10x10x128xf32, #tpu.memory_space<vmem>>, vector<1x10x128xf32>
    %228 = vector.shape_cast %227 : vector<1x10x128xf32> to vector<10x128xf32>
    %229 = arith.mulf %228, %226 : vector<10x128xf32>
    %230 = vector.extract_strided_slice %216 {offsets = [1, 0], sizes = [1, 128], strides = [1, 1]} : vector<10x128xf32> to vector<1x128xf32>
    %231 = vector.shape_cast %230 : vector<1x128xf32> to vector<1x128xf32>
    %232 = vector.broadcast %231 : vector<1x128xf32> to vector<10x128xf32>
    %c1_95 = arith.constant 1 : index
    %c0_96 = arith.constant 0 : index
    %c0_97 = arith.constant 0 : index
    %233 = vector.load %arg10[%c1_95, %c0_96, %c0_97] : memref<10x10x128xf32, #tpu.memory_space<vmem>>, vector<1x10x128xf32>
    %234 = vector.shape_cast %233 : vector<1x10x128xf32> to vector<10x128xf32>
    %235 = arith.mulf %234, %232 : vector<10x128xf32>
    %236 = vector.extract_strided_slice %216 {offsets = [2, 0], sizes = [1, 128], strides = [1, 1]} : vector<10x128xf32> to vector<1x128xf32>
    %237 = vector.shape_cast %236 : vector<1x128xf32> to vector<1x128xf32>
    %238 = vector.broadcast %237 : vector<1x128xf32> to vector<10x128xf32>
    %c2_98 = arith.constant 2 : index
    %c0_99 = arith.constant 0 : index
    %c0_100 = arith.constant 0 : index
    %239 = vector.load %arg10[%c2_98, %c0_99, %c0_100] : memref<10x10x128xf32, #tpu.memory_space<vmem>>, vector<1x10x128xf32>
    %240 = vector.shape_cast %239 : vector<1x10x128xf32> to vector<10x128xf32>
    %241 = arith.mulf %240, %238 : vector<10x128xf32>
    %242 = vector.extract_strided_slice %216 {offsets = [3, 0], sizes = [1, 128], strides = [1, 1]} : vector<10x128xf32> to vector<1x128xf32>
    %243 = vector.shape_cast %242 : vector<1x128xf32> to vector<1x128xf32>
    %244 = vector.broadcast %243 : vector<1x128xf32> to vector<10x128xf32>
    %c3_101 = arith.constant 3 : index
    %c0_102 = arith.constant 0 : index
    %c0_103 = arith.constant 0 : index
    %245 = vector.load %arg10[%c3_101, %c0_102, %c0_103] : memref<10x10x128xf32, #tpu.memory_space<vmem>>, vector<1x10x128xf32>
    %246 = vector.shape_cast %245 : vector<1x10x128xf32> to vector<10x128xf32>
    %247 = arith.mulf %246, %244 : vector<10x128xf32>
    %248 = vector.extract_strided_slice %216 {offsets = [4, 0], sizes = [1, 128], strides = [1, 1]} : vector<10x128xf32> to vector<1x128xf32>
    %249 = vector.shape_cast %248 : vector<1x128xf32> to vector<1x128xf32>
    %250 = vector.broadcast %249 : vector<1x128xf32> to vector<10x128xf32>
    %c4_104 = arith.constant 4 : index
    %c0_105 = arith.constant 0 : index
    %c0_106 = arith.constant 0 : index
    %251 = vector.load %arg10[%c4_104, %c0_105, %c0_106] : memref<10x10x128xf32, #tpu.memory_space<vmem>>, vector<1x10x128xf32>
    %252 = vector.shape_cast %251 : vector<1x10x128xf32> to vector<10x128xf32>
    %253 = arith.mulf %252, %250 : vector<10x128xf32>
    %254 = vector.extract_strided_slice %216 {offsets = [5, 0], sizes = [1, 128], strides = [1, 1]} : vector<10x128xf32> to vector<1x128xf32>
    %255 = vector.shape_cast %254 : vector<1x128xf32> to vector<1x128xf32>
    %256 = vector.broadcast %255 : vector<1x128xf32> to vector<10x128xf32>
    %c5_107 = arith.constant 5 : index
    %c0_108 = arith.constant 0 : index
    %c0_109 = arith.constant 0 : index
    %257 = vector.load %arg10[%c5_107, %c0_108, %c0_109] : memref<10x10x128xf32, #tpu.memory_space<vmem>>, vector<1x10x128xf32>
    %258 = vector.shape_cast %257 : vector<1x10x128xf32> to vector<10x128xf32>
    %259 = arith.mulf %258, %256 : vector<10x128xf32>
    %260 = vector.extract_strided_slice %216 {offsets = [6, 0], sizes = [1, 128], strides = [1, 1]} : vector<10x128xf32> to vector<1x128xf32>
    %261 = vector.shape_cast %260 : vector<1x128xf32> to vector<1x128xf32>
    %262 = vector.broadcast %261 : vector<1x128xf32> to vector<10x128xf32>
    %c6_110 = arith.constant 6 : index
    %c0_111 = arith.constant 0 : index
    %c0_112 = arith.constant 0 : index
    %263 = vector.load %arg10[%c6_110, %c0_111, %c0_112] : memref<10x10x128xf32, #tpu.memory_space<vmem>>, vector<1x10x128xf32>
    %264 = vector.shape_cast %263 : vector<1x10x128xf32> to vector<10x128xf32>
    %265 = arith.mulf %264, %262 : vector<10x128xf32>
    %266 = vector.extract_strided_slice %216 {offsets = [7, 0], sizes = [1, 128], strides = [1, 1]} : vector<10x128xf32> to vector<1x128xf32>
    %267 = vector.shape_cast %266 : vector<1x128xf32> to vector<1x128xf32>
    %268 = vector.broadcast %267 : vector<1x128xf32> to vector<10x128xf32>
    %c7_113 = arith.constant 7 : index
    %c0_114 = arith.constant 0 : index
    %c0_115 = arith.constant 0 : index
    %269 = vector.load %arg10[%c7_113, %c0_114, %c0_115] : memref<10x10x128xf32, #tpu.memory_space<vmem>>, vector<1x10x128xf32>
    %270 = vector.shape_cast %269 : vector<1x10x128xf32> to vector<10x128xf32>
    %271 = arith.mulf %270, %268 : vector<10x128xf32>
    %272 = vector.extract_strided_slice %216 {offsets = [8, 0], sizes = [1, 128], strides = [1, 1]} : vector<10x128xf32> to vector<1x128xf32>
    %273 = vector.shape_cast %272 : vector<1x128xf32> to vector<1x128xf32>
    %274 = vector.broadcast %273 : vector<1x128xf32> to vector<10x128xf32>
    %c8_116 = arith.constant 8 : index
    %c0_117 = arith.constant 0 : index
    %c0_118 = arith.constant 0 : index
    %275 = vector.load %arg10[%c8_116, %c0_117, %c0_118] : memref<10x10x128xf32, #tpu.memory_space<vmem>>, vector<1x10x128xf32>
    %276 = vector.shape_cast %275 : vector<1x10x128xf32> to vector<10x128xf32>
    %277 = arith.mulf %276, %274 : vector<10x128xf32>
    %278 = vector.extract_strided_slice %216 {offsets = [9, 0], sizes = [1, 128], strides = [1, 1]} : vector<10x128xf32> to vector<1x128xf32>
    %279 = vector.shape_cast %278 : vector<1x128xf32> to vector<1x128xf32>
    %280 = vector.broadcast %279 : vector<1x128xf32> to vector<10x128xf32>
    %c9_119 = arith.constant 9 : index
    %c0_120 = arith.constant 0 : index
    %c0_121 = arith.constant 0 : index
    %281 = vector.load %arg10[%c9_119, %c0_120, %c0_121] : memref<10x10x128xf32, #tpu.memory_space<vmem>>, vector<1x10x128xf32>
    %282 = vector.shape_cast %281 : vector<1x10x128xf32> to vector<10x128xf32>
    %283 = arith.mulf %282, %280 : vector<10x128xf32>
    %284 = arith.addf %223, %229 : vector<10x128xf32>
    %285 = arith.addf %235, %241 : vector<10x128xf32>
    %286 = arith.addf %247, %253 : vector<10x128xf32>
    %287 = arith.addf %259, %265 : vector<10x128xf32>
    %288 = arith.addf %271, %277 : vector<10x128xf32>
    %289 = arith.addf %284, %285 : vector<10x128xf32>
    %290 = arith.addf %286, %287 : vector<10x128xf32>
    %291 = arith.addf %288, %283 : vector<10x128xf32>
    %292 = arith.addf %289, %290 : vector<10x128xf32>
    %293 = arith.addf %292, %291 : vector<10x128xf32>
    %294 = math.tanh %293 : vector<10x128xf32>
    %295 = arith.index_cast %c1_i32_89 : i32 to index
    %c0_122 = arith.constant 0 : index
    %c0_123 = arith.constant 0 : index
    %296 = vector.load %arg9[%295, %c0_122, %c0_123] : memref<8x10x128xf32, #tpu.memory_space<vmem>>, vector<1x10x128xf32>
    %297 = vector.shape_cast %296 : vector<1x10x128xf32> to vector<10x128xf32>
    %298 = vector.shape_cast %294 : vector<10x128xf32> to vector<1x10x128xf32>
    tpu.vector_store %arg9[%295, %c0_122, %c0_123], %298 {strides = array<i32>} : memref<8x10x128xf32, #tpu.memory_space<vmem>>, vector<1x10x128xf32>,
    %c2_i32_124 = arith.constant 2 : i32
    %299 = arith.index_cast %c2_i32_124 : i32 to index
    %c0_125 = arith.constant 0 : index
    %c0_126 = arith.constant 0 : index
    %300 = vector.load %arg9[%299, %c0_125, %c0_126] : memref<8x10x128xf32, #tpu.memory_space<vmem>>, vector<1x10x128xf32>
    %301 = vector.shape_cast %300 : vector<1x10x128xf32> to vector<10x128xf32>
    %302 = vector.extract_strided_slice %294 {offsets = [0, 0], sizes = [1, 128], strides = [1, 1]} : vector<10x128xf32> to vector<1x128xf32>
    %303 = vector.shape_cast %302 : vector<1x128xf32> to vector<1x128xf32>
    %304 = vector.broadcast %303 : vector<1x128xf32> to vector<10x128xf32>
    %c0_127 = arith.constant 0 : index
    %c0_128 = arith.constant 0 : index
    %c0_129 = arith.constant 0 : index
    %305 = vector.load %arg10[%c0_127, %c0_128, %c0_129] : memref<10x10x128xf32, #tpu.memory_space<vmem>>, vector<1x10x128xf32>
    %306 = vector.shape_cast %305 : vector<1x10x128xf32> to vector<10x128xf32>
    %307 = arith.mulf %306, %304 : vector<10x128xf32>
    %308 = vector.extract_strided_slice %294 {offsets = [1, 0], sizes = [1, 128], strides = [1, 1]} : vector<10x128xf32> to vector<1x128xf32>
    %309 = vector.shape_cast %308 : vector<1x128xf32> to vector<1x128xf32>
    %310 = vector.broadcast %309 : vector<1x128xf32> to vector<10x128xf32>
    %c1_130 = arith.constant 1 : index
    %c0_131 = arith.constant 0 : index
    %c0_132 = arith.constant 0 : index
    %311 = vector.load %arg10[%c1_130, %c0_131, %c0_132] : memref<10x10x128xf32, #tpu.memory_space<vmem>>, vector<1x10x128xf32>
    %312 = vector.shape_cast %311 : vector<1x10x128xf32> to vector<10x128xf32>
    %313 = arith.mulf %312, %310 : vector<10x128xf32>
    %314 = vector.extract_strided_slice %294 {offsets = [2, 0], sizes = [1, 128], strides = [1, 1]} : vector<10x128xf32> to vector<1x128xf32>
    %315 = vector.shape_cast %314 : vector<1x128xf32> to vector<1x128xf32>
    %316 = vector.broadcast %315 : vector<1x128xf32> to vector<10x128xf32>
    %c2_133 = arith.constant 2 : index
    %c0_134 = arith.constant 0 : index
    %c0_135 = arith.constant 0 : index
    %317 = vector.load %arg10[%c2_133, %c0_134, %c0_135] : memref<10x10x128xf32, #tpu.memory_space<vmem>>, vector<1x10x128xf32>
    %318 = vector.shape_cast %317 : vector<1x10x128xf32> to vector<10x128xf32>
    %319 = arith.mulf %318, %316 : vector<10x128xf32>
    %320 = vector.extract_strided_slice %294 {offsets = [3, 0], sizes = [1, 128], strides = [1, 1]} : vector<10x128xf32> to vector<1x128xf32>
    %321 = vector.shape_cast %320 : vector<1x128xf32> to vector<1x128xf32>
    %322 = vector.broadcast %321 : vector<1x128xf32> to vector<10x128xf32>
    %c3_136 = arith.constant 3 : index
    %c0_137 = arith.constant 0 : index
    %c0_138 = arith.constant 0 : index
    %323 = vector.load %arg10[%c3_136, %c0_137, %c0_138] : memref<10x10x128xf32, #tpu.memory_space<vmem>>, vector<1x10x128xf32>
    %324 = vector.shape_cast %323 : vector<1x10x128xf32> to vector<10x128xf32>
    %325 = arith.mulf %324, %322 : vector<10x128xf32>
    %326 = vector.extract_strided_slice %294 {offsets = [4, 0], sizes = [1, 128], strides = [1, 1]} : vector<10x128xf32> to vector<1x128xf32>
    %327 = vector.shape_cast %326 : vector<1x128xf32> to vector<1x128xf32>
    %328 = vector.broadcast %327 : vector<1x128xf32> to vector<10x128xf32>
    %c4_139 = arith.constant 4 : index
    %c0_140 = arith.constant 0 : index
    %c0_141 = arith.constant 0 : index
    %329 = vector.load %arg10[%c4_139, %c0_140, %c0_141] : memref<10x10x128xf32, #tpu.memory_space<vmem>>, vector<1x10x128xf32>
    %330 = vector.shape_cast %329 : vector<1x10x128xf32> to vector<10x128xf32>
    %331 = arith.mulf %330, %328 : vector<10x128xf32>
    %332 = vector.extract_strided_slice %294 {offsets = [5, 0], sizes = [1, 128], strides = [1, 1]} : vector<10x128xf32> to vector<1x128xf32>
    %333 = vector.shape_cast %332 : vector<1x128xf32> to vector<1x128xf32>
    %334 = vector.broadcast %333 : vector<1x128xf32> to vector<10x128xf32>
    %c5_142 = arith.constant 5 : index
    %c0_143 = arith.constant 0 : index
    %c0_144 = arith.constant 0 : index
    %335 = vector.load %arg10[%c5_142, %c0_143, %c0_144] : memref<10x10x128xf32, #tpu.memory_space<vmem>>, vector<1x10x128xf32>
    %336 = vector.shape_cast %335 : vector<1x10x128xf32> to vector<10x128xf32>
    %337 = arith.mulf %336, %334 : vector<10x128xf32>
    %338 = vector.extract_strided_slice %294 {offsets = [6, 0], sizes = [1, 128], strides = [1, 1]} : vector<10x128xf32> to vector<1x128xf32>
    %339 = vector.shape_cast %338 : vector<1x128xf32> to vector<1x128xf32>
    %340 = vector.broadcast %339 : vector<1x128xf32> to vector<10x128xf32>
    %c6_145 = arith.constant 6 : index
    %c0_146 = arith.constant 0 : index
    %c0_147 = arith.constant 0 : index
    %341 = vector.load %arg10[%c6_145, %c0_146, %c0_147] : memref<10x10x128xf32, #tpu.memory_space<vmem>>, vector<1x10x128xf32>
    %342 = vector.shape_cast %341 : vector<1x10x128xf32> to vector<10x128xf32>
    %343 = arith.mulf %342, %340 : vector<10x128xf32>
    %344 = vector.extract_strided_slice %294 {offsets = [7, 0], sizes = [1, 128], strides = [1, 1]} : vector<10x128xf32> to vector<1x128xf32>
    %345 = vector.shape_cast %344 : vector<1x128xf32> to vector<1x128xf32>
    %346 = vector.broadcast %345 : vector<1x128xf32> to vector<10x128xf32>
    %c7_148 = arith.constant 7 : index
    %c0_149 = arith.constant 0 : index
    %c0_150 = arith.constant 0 : index
    %347 = vector.load %arg10[%c7_148, %c0_149, %c0_150] : memref<10x10x128xf32, #tpu.memory_space<vmem>>, vector<1x10x128xf32>
    %348 = vector.shape_cast %347 : vector<1x10x128xf32> to vector<10x128xf32>
    %349 = arith.mulf %348, %346 : vector<10x128xf32>
    %350 = vector.extract_strided_slice %294 {offsets = [8, 0], sizes = [1, 128], strides = [1, 1]} : vector<10x128xf32> to vector<1x128xf32>
    %351 = vector.shape_cast %350 : vector<1x128xf32> to vector<1x128xf32>
    %352 = vector.broadcast %351 : vector<1x128xf32> to vector<10x128xf32>
    %c8_151 = arith.constant 8 : index
    %c0_152 = arith.constant 0 : index
    %c0_153 = arith.constant 0 : index
    %353 = vector.load %arg10[%c8_151, %c0_152, %c0_153] : memref<10x10x128xf32, #tpu.memory_space<vmem>>, vector<1x10x128xf32>
    %354 = vector.shape_cast %353 : vector<1x10x128xf32> to vector<10x128xf32>
    %355 = arith.mulf %354, %352 : vector<10x128xf32>
    %356 = vector.extract_strided_slice %294 {offsets = [9, 0], sizes = [1, 128], strides = [1, 1]} : vector<10x128xf32> to vector<1x128xf32>
    %357 = vector.shape_cast %356 : vector<1x128xf32> to vector<1x128xf32>
    %358 = vector.broadcast %357 : vector<1x128xf32> to vector<10x128xf32>
    %c9_154 = arith.constant 9 : index
    %c0_155 = arith.constant 0 : index
    %c0_156 = arith.constant 0 : index
    %359 = vector.load %arg10[%c9_154, %c0_155, %c0_156] : memref<10x10x128xf32, #tpu.memory_space<vmem>>, vector<1x10x128xf32>
    %360 = vector.shape_cast %359 : vector<1x10x128xf32> to vector<10x128xf32>
    %361 = arith.mulf %360, %358 : vector<10x128xf32>
    %362 = arith.addf %301, %307 : vector<10x128xf32>
    %363 = arith.addf %313, %319 : vector<10x128xf32>
    %364 = arith.addf %325, %331 : vector<10x128xf32>
    %365 = arith.addf %337, %343 : vector<10x128xf32>
    %366 = arith.addf %349, %355 : vector<10x128xf32>
    %367 = arith.addf %362, %363 : vector<10x128xf32>
    %368 = arith.addf %364, %365 : vector<10x128xf32>
    %369 = arith.addf %366, %361 : vector<10x128xf32>
    %370 = arith.addf %367, %368 : vector<10x128xf32>
    %371 = arith.addf %370, %369 : vector<10x128xf32>
    %372 = math.tanh %371 : vector<10x128xf32>
    %373 = arith.index_cast %c2_i32_124 : i32 to index
    %c0_157 = arith.constant 0 : index
    %c0_158 = arith.constant 0 : index
    %374 = vector.load %arg9[%373, %c0_157, %c0_158] : memref<8x10x128xf32, #tpu.memory_space<vmem>>, vector<1x10x128xf32>
    %375 = vector.shape_cast %374 : vector<1x10x128xf32> to vector<10x128xf32>
    %376 = vector.shape_cast %372 : vector<10x128xf32> to vector<1x10x128xf32>
    tpu.vector_store %arg9[%373, %c0_157, %c0_158], %376 {strides = array<i32>} : memref<8x10x128xf32, #tpu.memory_space<vmem>>, vector<1x10x128xf32>,
    %c3_i32_159 = arith.constant 3 : i32
    %377 = arith.index_cast %c3_i32_159 : i32 to index
    %c0_160 = arith.constant 0 : index
    %c0_161 = arith.constant 0 : index
    %378 = vector.load %arg9[%377, %c0_160, %c0_161] : memref<8x10x128xf32, #tpu.memory_space<vmem>>, vector<1x10x128xf32>
    %379 = vector.shape_cast %378 : vector<1x10x128xf32> to vector<10x128xf32>
    %380 = vector.extract_strided_slice %372 {offsets = [0, 0], sizes = [1, 128], strides = [1, 1]} : vector<10x128xf32> to vector<1x128xf32>
    %381 = vector.shape_cast %380 : vector<1x128xf32> to vector<1x128xf32>
    %382 = vector.broadcast %381 : vector<1x128xf32> to vector<10x128xf32>
    %c0_162 = arith.constant 0 : index
    %c0_163 = arith.constant 0 : index
    %c0_164 = arith.constant 0 : index
    %383 = vector.load %arg10[%c0_162, %c0_163, %c0_164] : memref<10x10x128xf32, #tpu.memory_space<vmem>>, vector<1x10x128xf32>
    %384 = vector.shape_cast %383 : vector<1x10x128xf32> to vector<10x128xf32>
    %385 = arith.mulf %384, %382 : vector<10x128xf32>
    %386 = vector.extract_strided_slice %372 {offsets = [1, 0], sizes = [1, 128], strides = [1, 1]} : vector<10x128xf32> to vector<1x128xf32>
    %387 = vector.shape_cast %386 : vector<1x128xf32> to vector<1x128xf32>
    %388 = vector.broadcast %387 : vector<1x128xf32> to vector<10x128xf32>
    %c1_165 = arith.constant 1 : index
    %c0_166 = arith.constant 0 : index
    %c0_167 = arith.constant 0 : index
    %389 = vector.load %arg10[%c1_165, %c0_166, %c0_167] : memref<10x10x128xf32, #tpu.memory_space<vmem>>, vector<1x10x128xf32>
    %390 = vector.shape_cast %389 : vector<1x10x128xf32> to vector<10x128xf32>
    %391 = arith.mulf %390, %388 : vector<10x128xf32>
    %392 = vector.extract_strided_slice %372 {offsets = [2, 0], sizes = [1, 128], strides = [1, 1]} : vector<10x128xf32> to vector<1x128xf32>
    %393 = vector.shape_cast %392 : vector<1x128xf32> to vector<1x128xf32>
    %394 = vector.broadcast %393 : vector<1x128xf32> to vector<10x128xf32>
    %c2_168 = arith.constant 2 : index
    %c0_169 = arith.constant 0 : index
    %c0_170 = arith.constant 0 : index
    %395 = vector.load %arg10[%c2_168, %c0_169, %c0_170] : memref<10x10x128xf32, #tpu.memory_space<vmem>>, vector<1x10x128xf32>
    %396 = vector.shape_cast %395 : vector<1x10x128xf32> to vector<10x128xf32>
    %397 = arith.mulf %396, %394 : vector<10x128xf32>
    %398 = vector.extract_strided_slice %372 {offsets = [3, 0], sizes = [1, 128], strides = [1, 1]} : vector<10x128xf32> to vector<1x128xf32>
    %399 = vector.shape_cast %398 : vector<1x128xf32> to vector<1x128xf32>
    %400 = vector.broadcast %399 : vector<1x128xf32> to vector<10x128xf32>
    %c3_171 = arith.constant 3 : index
    %c0_172 = arith.constant 0 : index
    %c0_173 = arith.constant 0 : index
    %401 = vector.load %arg10[%c3_171, %c0_172, %c0_173] : memref<10x10x128xf32, #tpu.memory_space<vmem>>, vector<1x10x128xf32>
    %402 = vector.shape_cast %401 : vector<1x10x128xf32> to vector<10x128xf32>
    %403 = arith.mulf %402, %400 : vector<10x128xf32>
    %404 = vector.extract_strided_slice %372 {offsets = [4, 0], sizes = [1, 128], strides = [1, 1]} : vector<10x128xf32> to vector<1x128xf32>
    %405 = vector.shape_cast %404 : vector<1x128xf32> to vector<1x128xf32>
    %406 = vector.broadcast %405 : vector<1x128xf32> to vector<10x128xf32>
    %c4_174 = arith.constant 4 : index
    %c0_175 = arith.constant 0 : index
    %c0_176 = arith.constant 0 : index
    %407 = vector.load %arg10[%c4_174, %c0_175, %c0_176] : memref<10x10x128xf32, #tpu.memory_space<vmem>>, vector<1x10x128xf32>
    %408 = vector.shape_cast %407 : vector<1x10x128xf32> to vector<10x128xf32>
    %409 = arith.mulf %408, %406 : vector<10x128xf32>
    %410 = vector.extract_strided_slice %372 {offsets = [5, 0], sizes = [1, 128], strides = [1, 1]} : vector<10x128xf32> to vector<1x128xf32>
    %411 = vector.shape_cast %410 : vector<1x128xf32> to vector<1x128xf32>
    %412 = vector.broadcast %411 : vector<1x128xf32> to vector<10x128xf32>
    %c5_177 = arith.constant 5 : index
    %c0_178 = arith.constant 0 : index
    %c0_179 = arith.constant 0 : index
    %413 = vector.load %arg10[%c5_177, %c0_178, %c0_179] : memref<10x10x128xf32, #tpu.memory_space<vmem>>, vector<1x10x128xf32>
    %414 = vector.shape_cast %413 : vector<1x10x128xf32> to vector<10x128xf32>
    %415 = arith.mulf %414, %412 : vector<10x128xf32>
    %416 = vector.extract_strided_slice %372 {offsets = [6, 0], sizes = [1, 128], strides = [1, 1]} : vector<10x128xf32> to vector<1x128xf32>
    %417 = vector.shape_cast %416 : vector<1x128xf32> to vector<1x128xf32>
    %418 = vector.broadcast %417 : vector<1x128xf32> to vector<10x128xf32>
    %c6_180 = arith.constant 6 : index
    %c0_181 = arith.constant 0 : index
    %c0_182 = arith.constant 0 : index
    %419 = vector.load %arg10[%c6_180, %c0_181, %c0_182] : memref<10x10x128xf32, #tpu.memory_space<vmem>>, vector<1x10x128xf32>
    %420 = vector.shape_cast %419 : vector<1x10x128xf32> to vector<10x128xf32>
    %421 = arith.mulf %420, %418 : vector<10x128xf32>
    %422 = vector.extract_strided_slice %372 {offsets = [7, 0], sizes = [1, 128], strides = [1, 1]} : vector<10x128xf32> to vector<1x128xf32>
    %423 = vector.shape_cast %422 : vector<1x128xf32> to vector<1x128xf32>
    %424 = vector.broadcast %423 : vector<1x128xf32> to vector<10x128xf32>
    %c7_183 = arith.constant 7 : index
    %c0_184 = arith.constant 0 : index
    %c0_185 = arith.constant 0 : index
    %425 = vector.load %arg10[%c7_183, %c0_184, %c0_185] : memref<10x10x128xf32, #tpu.memory_space<vmem>>, vector<1x10x128xf32>
    %426 = vector.shape_cast %425 : vector<1x10x128xf32> to vector<10x128xf32>
    %427 = arith.mulf %426, %424 : vector<10x128xf32>
    %428 = vector.extract_strided_slice %372 {offsets = [8, 0], sizes = [1, 128], strides = [1, 1]} : vector<10x128xf32> to vector<1x128xf32>
    %429 = vector.shape_cast %428 : vector<1x128xf32> to vector<1x128xf32>
    %430 = vector.broadcast %429 : vector<1x128xf32> to vector<10x128xf32>
    %c8_186 = arith.constant 8 : index
    %c0_187 = arith.constant 0 : index
    %c0_188 = arith.constant 0 : index
    %431 = vector.load %arg10[%c8_186, %c0_187, %c0_188] : memref<10x10x128xf32, #tpu.memory_space<vmem>>, vector<1x10x128xf32>
    %432 = vector.shape_cast %431 : vector<1x10x128xf32> to vector<10x128xf32>
    %433 = arith.mulf %432, %430 : vector<10x128xf32>
    %434 = vector.extract_strided_slice %372 {offsets = [9, 0], sizes = [1, 128], strides = [1, 1]} : vector<10x128xf32> to vector<1x128xf32>
    %435 = vector.shape_cast %434 : vector<1x128xf32> to vector<1x128xf32>
    %436 = vector.broadcast %435 : vector<1x128xf32> to vector<10x128xf32>
    %c9_189 = arith.constant 9 : index
    %c0_190 = arith.constant 0 : index
    %c0_191 = arith.constant 0 : index
    %437 = vector.load %arg10[%c9_189, %c0_190, %c0_191] : memref<10x10x128xf32, #tpu.memory_space<vmem>>, vector<1x10x128xf32>
    %438 = vector.shape_cast %437 : vector<1x10x128xf32> to vector<10x128xf32>
    %439 = arith.mulf %438, %436 : vector<10x128xf32>
    %440 = arith.addf %379, %385 : vector<10x128xf32>
    %441 = arith.addf %391, %397 : vector<10x128xf32>
    %442 = arith.addf %403, %409 : vector<10x128xf32>
    %443 = arith.addf %415, %421 : vector<10x128xf32>
    %444 = arith.addf %427, %433 : vector<10x128xf32>
    %445 = arith.addf %440, %441 : vector<10x128xf32>
    %446 = arith.addf %442, %443 : vector<10x128xf32>
    %447 = arith.addf %444, %439 : vector<10x128xf32>
    %448 = arith.addf %445, %446 : vector<10x128xf32>
    %449 = arith.addf %448, %447 : vector<10x128xf32>
    %450 = math.tanh %449 : vector<10x128xf32>
    %451 = arith.index_cast %c3_i32_159 : i32 to index
    %c0_192 = arith.constant 0 : index
    %c0_193 = arith.constant 0 : index
    %452 = vector.load %arg9[%451, %c0_192, %c0_193] : memref<8x10x128xf32, #tpu.memory_space<vmem>>, vector<1x10x128xf32>
    %453 = vector.shape_cast %452 : vector<1x10x128xf32> to vector<10x128xf32>
    %454 = vector.shape_cast %450 : vector<10x128xf32> to vector<1x10x128xf32>
    tpu.vector_store %arg9[%451, %c0_192, %c0_193], %454 {strides = array<i32>} : memref<8x10x128xf32, #tpu.memory_space<vmem>>, vector<1x10x128xf32>,
    %c4_i32_194 = arith.constant 4 : i32
    %455 = arith.index_cast %c4_i32_194 : i32 to index
    %c0_195 = arith.constant 0 : index
    %c0_196 = arith.constant 0 : index
    %456 = vector.load %arg9[%455, %c0_195, %c0_196] : memref<8x10x128xf32, #tpu.memory_space<vmem>>, vector<1x10x128xf32>
    %457 = vector.shape_cast %456 : vector<1x10x128xf32> to vector<10x128xf32>
    %458 = vector.extract_strided_slice %450 {offsets = [0, 0], sizes = [1, 128], strides = [1, 1]} : vector<10x128xf32> to vector<1x128xf32>
    %459 = vector.shape_cast %458 : vector<1x128xf32> to vector<1x128xf32>
    %460 = vector.broadcast %459 : vector<1x128xf32> to vector<10x128xf32>
    %c0_197 = arith.constant 0 : index
    %c0_198 = arith.constant 0 : index
    %c0_199 = arith.constant 0 : index
    %461 = vector.load %arg10[%c0_197, %c0_198, %c0_199] : memref<10x10x128xf32, #tpu.memory_space<vmem>>, vector<1x10x128xf32>
    %462 = vector.shape_cast %461 : vector<1x10x128xf32> to vector<10x128xf32>
    %463 = arith.mulf %462, %460 : vector<10x128xf32>
    %464 = vector.extract_strided_slice %450 {offsets = [1, 0], sizes = [1, 128], strides = [1, 1]} : vector<10x128xf32> to vector<1x128xf32>
    %465 = vector.shape_cast %464 : vector<1x128xf32> to vector<1x128xf32>
    %466 = vector.broadcast %465 : vector<1x128xf32> to vector<10x128xf32>
    %c1_200 = arith.constant 1 : index
    %c0_201 = arith.constant 0 : index
    %c0_202 = arith.constant 0 : index
    %467 = vector.load %arg10[%c1_200, %c0_201, %c0_202] : memref<10x10x128xf32, #tpu.memory_space<vmem>>, vector<1x10x128xf32>
    %468 = vector.shape_cast %467 : vector<1x10x128xf32> to vector<10x128xf32>
    %469 = arith.mulf %468, %466 : vector<10x128xf32>
    %470 = vector.extract_strided_slice %450 {offsets = [2, 0], sizes = [1, 128], strides = [1, 1]} : vector<10x128xf32> to vector<1x128xf32>
    %471 = vector.shape_cast %470 : vector<1x128xf32> to vector<1x128xf32>
    %472 = vector.broadcast %471 : vector<1x128xf32> to vector<10x128xf32>
    %c2_203 = arith.constant 2 : index
    %c0_204 = arith.constant 0 : index
    %c0_205 = arith.constant 0 : index
    %473 = vector.load %arg10[%c2_203, %c0_204, %c0_205] : memref<10x10x128xf32, #tpu.memory_space<vmem>>, vector<1x10x128xf32>
    %474 = vector.shape_cast %473 : vector<1x10x128xf32> to vector<10x128xf32>
    %475 = arith.mulf %474, %472 : vector<10x128xf32>
    %476 = vector.extract_strided_slice %450 {offsets = [3, 0], sizes = [1, 128], strides = [1, 1]} : vector<10x128xf32> to vector<1x128xf32>
    %477 = vector.shape_cast %476 : vector<1x128xf32> to vector<1x128xf32>
    %478 = vector.broadcast %477 : vector<1x128xf32> to vector<10x128xf32>
    %c3_206 = arith.constant 3 : index
    %c0_207 = arith.constant 0 : index
    %c0_208 = arith.constant 0 : index
    %479 = vector.load %arg10[%c3_206, %c0_207, %c0_208] : memref<10x10x128xf32, #tpu.memory_space<vmem>>, vector<1x10x128xf32>
    %480 = vector.shape_cast %479 : vector<1x10x128xf32> to vector<10x128xf32>
    %481 = arith.mulf %480, %478 : vector<10x128xf32>
    %482 = vector.extract_strided_slice %450 {offsets = [4, 0], sizes = [1, 128], strides = [1, 1]} : vector<10x128xf32> to vector<1x128xf32>
    %483 = vector.shape_cast %482 : vector<1x128xf32> to vector<1x128xf32>
    %484 = vector.broadcast %483 : vector<1x128xf32> to vector<10x128xf32>
    %c4_209 = arith.constant 4 : index
    %c0_210 = arith.constant 0 : index
    %c0_211 = arith.constant 0 : index
    %485 = vector.load %arg10[%c4_209, %c0_210, %c0_211] : memref<10x10x128xf32, #tpu.memory_space<vmem>>, vector<1x10x128xf32>
    %486 = vector.shape_cast %485 : vector<1x10x128xf32> to vector<10x128xf32>
    %487 = arith.mulf %486, %484 : vector<10x128xf32>
    %488 = vector.extract_strided_slice %450 {offsets = [5, 0], sizes = [1, 128], strides = [1, 1]} : vector<10x128xf32> to vector<1x128xf32>
    %489 = vector.shape_cast %488 : vector<1x128xf32> to vector<1x128xf32>
    %490 = vector.broadcast %489 : vector<1x128xf32> to vector<10x128xf32>
    %c5_212 = arith.constant 5 : index
    %c0_213 = arith.constant 0 : index
    %c0_214 = arith.constant 0 : index
    %491 = vector.load %arg10[%c5_212, %c0_213, %c0_214] : memref<10x10x128xf32, #tpu.memory_space<vmem>>, vector<1x10x128xf32>
    %492 = vector.shape_cast %491 : vector<1x10x128xf32> to vector<10x128xf32>
    %493 = arith.mulf %492, %490 : vector<10x128xf32>
    %494 = vector.extract_strided_slice %450 {offsets = [6, 0], sizes = [1, 128], strides = [1, 1]} : vector<10x128xf32> to vector<1x128xf32>
    %495 = vector.shape_cast %494 : vector<1x128xf32> to vector<1x128xf32>
    %496 = vector.broadcast %495 : vector<1x128xf32> to vector<10x128xf32>
    %c6_215 = arith.constant 6 : index
    %c0_216 = arith.constant 0 : index
    %c0_217 = arith.constant 0 : index
    %497 = vector.load %arg10[%c6_215, %c0_216, %c0_217] : memref<10x10x128xf32, #tpu.memory_space<vmem>>, vector<1x10x128xf32>
    %498 = vector.shape_cast %497 : vector<1x10x128xf32> to vector<10x128xf32>
    %499 = arith.mulf %498, %496 : vector<10x128xf32>
    %500 = vector.extract_strided_slice %450 {offsets = [7, 0], sizes = [1, 128], strides = [1, 1]} : vector<10x128xf32> to vector<1x128xf32>
    %501 = vector.shape_cast %500 : vector<1x128xf32> to vector<1x128xf32>
    %502 = vector.broadcast %501 : vector<1x128xf32> to vector<10x128xf32>
    %c7_218 = arith.constant 7 : index
    %c0_219 = arith.constant 0 : index
    %c0_220 = arith.constant 0 : index
    %503 = vector.load %arg10[%c7_218, %c0_219, %c0_220] : memref<10x10x128xf32, #tpu.memory_space<vmem>>, vector<1x10x128xf32>
    %504 = vector.shape_cast %503 : vector<1x10x128xf32> to vector<10x128xf32>
    %505 = arith.mulf %504, %502 : vector<10x128xf32>
    %506 = vector.extract_strided_slice %450 {offsets = [8, 0], sizes = [1, 128], strides = [1, 1]} : vector<10x128xf32> to vector<1x128xf32>
    %507 = vector.shape_cast %506 : vector<1x128xf32> to vector<1x128xf32>
    %508 = vector.broadcast %507 : vector<1x128xf32> to vector<10x128xf32>
    %c8_221 = arith.constant 8 : index
    %c0_222 = arith.constant 0 : index
    %c0_223 = arith.constant 0 : index
    %509 = vector.load %arg10[%c8_221, %c0_222, %c0_223] : memref<10x10x128xf32, #tpu.memory_space<vmem>>, vector<1x10x128xf32>
    %510 = vector.shape_cast %509 : vector<1x10x128xf32> to vector<10x128xf32>
    %511 = arith.mulf %510, %508 : vector<10x128xf32>
    %512 = vector.extract_strided_slice %450 {offsets = [9, 0], sizes = [1, 128], strides = [1, 1]} : vector<10x128xf32> to vector<1x128xf32>
    %513 = vector.shape_cast %512 : vector<1x128xf32> to vector<1x128xf32>
    %514 = vector.broadcast %513 : vector<1x128xf32> to vector<10x128xf32>
    %c9_224 = arith.constant 9 : index
    %c0_225 = arith.constant 0 : index
    %c0_226 = arith.constant 0 : index
    %515 = vector.load %arg10[%c9_224, %c0_225, %c0_226] : memref<10x10x128xf32, #tpu.memory_space<vmem>>, vector<1x10x128xf32>
    %516 = vector.shape_cast %515 : vector<1x10x128xf32> to vector<10x128xf32>
    %517 = arith.mulf %516, %514 : vector<10x128xf32>
    %518 = arith.addf %457, %463 : vector<10x128xf32>
    %519 = arith.addf %469, %475 : vector<10x128xf32>
    %520 = arith.addf %481, %487 : vector<10x128xf32>
    %521 = arith.addf %493, %499 : vector<10x128xf32>
    %522 = arith.addf %505, %511 : vector<10x128xf32>
    %523 = arith.addf %518, %519 : vector<10x128xf32>
    %524 = arith.addf %520, %521 : vector<10x128xf32>
    %525 = arith.addf %522, %517 : vector<10x128xf32>
    %526 = arith.addf %523, %524 : vector<10x128xf32>
    %527 = arith.addf %526, %525 : vector<10x128xf32>
    %528 = math.tanh %527 : vector<10x128xf32>
    %529 = arith.index_cast %c4_i32_194 : i32 to index
    %c0_227 = arith.constant 0 : index
    %c0_228 = arith.constant 0 : index
    %530 = vector.load %arg9[%529, %c0_227, %c0_228] : memref<8x10x128xf32, #tpu.memory_space<vmem>>, vector<1x10x128xf32>
    %531 = vector.shape_cast %530 : vector<1x10x128xf32> to vector<10x128xf32>
    %532 = vector.shape_cast %528 : vector<10x128xf32> to vector<1x10x128xf32>
    tpu.vector_store %arg9[%529, %c0_227, %c0_228], %532 {strides = array<i32>} : memref<8x10x128xf32, #tpu.memory_space<vmem>>, vector<1x10x128xf32>,
    %c5_i32_229 = arith.constant 5 : i32
    %533 = arith.index_cast %c5_i32_229 : i32 to index
    %c0_230 = arith.constant 0 : index
    %c0_231 = arith.constant 0 : index
    %534 = vector.load %arg9[%533, %c0_230, %c0_231] : memref<8x10x128xf32, #tpu.memory_space<vmem>>, vector<1x10x128xf32>
    %535 = vector.shape_cast %534 : vector<1x10x128xf32> to vector<10x128xf32>
    %536 = vector.extract_strided_slice %528 {offsets = [0, 0], sizes = [1, 128], strides = [1, 1]} : vector<10x128xf32> to vector<1x128xf32>
    %537 = vector.shape_cast %536 : vector<1x128xf32> to vector<1x128xf32>
    %538 = vector.broadcast %537 : vector<1x128xf32> to vector<10x128xf32>
    %c0_232 = arith.constant 0 : index
    %c0_233 = arith.constant 0 : index
    %c0_234 = arith.constant 0 : index
    %539 = vector.load %arg10[%c0_232, %c0_233, %c0_234] : memref<10x10x128xf32, #tpu.memory_space<vmem>>, vector<1x10x128xf32>
    %540 = vector.shape_cast %539 : vector<1x10x128xf32> to vector<10x128xf32>
    %541 = arith.mulf %540, %538 : vector<10x128xf32>
    %542 = vector.extract_strided_slice %528 {offsets = [1, 0], sizes = [1, 128], strides = [1, 1]} : vector<10x128xf32> to vector<1x128xf32>
    %543 = vector.shape_cast %542 : vector<1x128xf32> to vector<1x128xf32>
    %544 = vector.broadcast %543 : vector<1x128xf32> to vector<10x128xf32>
    %c1_235 = arith.constant 1 : index
    %c0_236 = arith.constant 0 : index
    %c0_237 = arith.constant 0 : index
    %545 = vector.load %arg10[%c1_235, %c0_236, %c0_237] : memref<10x10x128xf32, #tpu.memory_space<vmem>>, vector<1x10x128xf32>
    %546 = vector.shape_cast %545 : vector<1x10x128xf32> to vector<10x128xf32>
    %547 = arith.mulf %546, %544 : vector<10x128xf32>
    %548 = vector.extract_strided_slice %528 {offsets = [2, 0], sizes = [1, 128], strides = [1, 1]} : vector<10x128xf32> to vector<1x128xf32>
    %549 = vector.shape_cast %548 : vector<1x128xf32> to vector<1x128xf32>
    %550 = vector.broadcast %549 : vector<1x128xf32> to vector<10x128xf32>
    %c2_238 = arith.constant 2 : index
    %c0_239 = arith.constant 0 : index
    %c0_240 = arith.constant 0 : index
    %551 = vector.load %arg10[%c2_238, %c0_239, %c0_240] : memref<10x10x128xf32, #tpu.memory_space<vmem>>, vector<1x10x128xf32>
    %552 = vector.shape_cast %551 : vector<1x10x128xf32> to vector<10x128xf32>
    %553 = arith.mulf %552, %550 : vector<10x128xf32>
    %554 = vector.extract_strided_slice %528 {offsets = [3, 0], sizes = [1, 128], strides = [1, 1]} : vector<10x128xf32> to vector<1x128xf32>
    %555 = vector.shape_cast %554 : vector<1x128xf32> to vector<1x128xf32>
    %556 = vector.broadcast %555 : vector<1x128xf32> to vector<10x128xf32>
    %c3_241 = arith.constant 3 : index
    %c0_242 = arith.constant 0 : index
    %c0_243 = arith.constant 0 : index
    %557 = vector.load %arg10[%c3_241, %c0_242, %c0_243] : memref<10x10x128xf32, #tpu.memory_space<vmem>>, vector<1x10x128xf32>
    %558 = vector.shape_cast %557 : vector<1x10x128xf32> to vector<10x128xf32>
    %559 = arith.mulf %558, %556 : vector<10x128xf32>
    %560 = vector.extract_strided_slice %528 {offsets = [4, 0], sizes = [1, 128], strides = [1, 1]} : vector<10x128xf32> to vector<1x128xf32>
    %561 = vector.shape_cast %560 : vector<1x128xf32> to vector<1x128xf32>
    %562 = vector.broadcast %561 : vector<1x128xf32> to vector<10x128xf32>
    %c4_244 = arith.constant 4 : index
    %c0_245 = arith.constant 0 : index
    %c0_246 = arith.constant 0 : index
    %563 = vector.load %arg10[%c4_244, %c0_245, %c0_246] : memref<10x10x128xf32, #tpu.memory_space<vmem>>, vector<1x10x128xf32>
    %564 = vector.shape_cast %563 : vector<1x10x128xf32> to vector<10x128xf32>
    %565 = arith.mulf %564, %562 : vector<10x128xf32>
    %566 = vector.extract_strided_slice %528 {offsets = [5, 0], sizes = [1, 128], strides = [1, 1]} : vector<10x128xf32> to vector<1x128xf32>
    %567 = vector.shape_cast %566 : vector<1x128xf32> to vector<1x128xf32>
    %568 = vector.broadcast %567 : vector<1x128xf32> to vector<10x128xf32>
    %c5_247 = arith.constant 5 : index
    %c0_248 = arith.constant 0 : index
    %c0_249 = arith.constant 0 : index
    %569 = vector.load %arg10[%c5_247, %c0_248, %c0_249] : memref<10x10x128xf32, #tpu.memory_space<vmem>>, vector<1x10x128xf32>
    %570 = vector.shape_cast %569 : vector<1x10x128xf32> to vector<10x128xf32>
    %571 = arith.mulf %570, %568 : vector<10x128xf32>
    %572 = vector.extract_strided_slice %528 {offsets = [6, 0], sizes = [1, 128], strides = [1, 1]} : vector<10x128xf32> to vector<1x128xf32>
    %573 = vector.shape_cast %572 : vector<1x128xf32> to vector<1x128xf32>
    %574 = vector.broadcast %573 : vector<1x128xf32> to vector<10x128xf32>
    %c6_250 = arith.constant 6 : index
    %c0_251 = arith.constant 0 : index
    %c0_252 = arith.constant 0 : index
    %575 = vector.load %arg10[%c6_250, %c0_251, %c0_252] : memref<10x10x128xf32, #tpu.memory_space<vmem>>, vector<1x10x128xf32>
    %576 = vector.shape_cast %575 : vector<1x10x128xf32> to vector<10x128xf32>
    %577 = arith.mulf %576, %574 : vector<10x128xf32>
    %578 = vector.extract_strided_slice %528 {offsets = [7, 0], sizes = [1, 128], strides = [1, 1]} : vector<10x128xf32> to vector<1x128xf32>
    %579 = vector.shape_cast %578 : vector<1x128xf32> to vector<1x128xf32>
    %580 = vector.broadcast %579 : vector<1x128xf32> to vector<10x128xf32>
    %c7_253 = arith.constant 7 : index
    %c0_254 = arith.constant 0 : index
    %c0_255 = arith.constant 0 : index
    %581 = vector.load %arg10[%c7_253, %c0_254, %c0_255] : memref<10x10x128xf32, #tpu.memory_space<vmem>>, vector<1x10x128xf32>
    %582 = vector.shape_cast %581 : vector<1x10x128xf32> to vector<10x128xf32>
    %583 = arith.mulf %582, %580 : vector<10x128xf32>
    %584 = vector.extract_strided_slice %528 {offsets = [8, 0], sizes = [1, 128], strides = [1, 1]} : vector<10x128xf32> to vector<1x128xf32>
    %585 = vector.shape_cast %584 : vector<1x128xf32> to vector<1x128xf32>
    %586 = vector.broadcast %585 : vector<1x128xf32> to vector<10x128xf32>
    %c8_256 = arith.constant 8 : index
    %c0_257 = arith.constant 0 : index
    %c0_258 = arith.constant 0 : index
    %587 = vector.load %arg10[%c8_256, %c0_257, %c0_258] : memref<10x10x128xf32, #tpu.memory_space<vmem>>, vector<1x10x128xf32>
    %588 = vector.shape_cast %587 : vector<1x10x128xf32> to vector<10x128xf32>
    %589 = arith.mulf %588, %586 : vector<10x128xf32>
    %590 = vector.extract_strided_slice %528 {offsets = [9, 0], sizes = [1, 128], strides = [1, 1]} : vector<10x128xf32> to vector<1x128xf32>
    %591 = vector.shape_cast %590 : vector<1x128xf32> to vector<1x128xf32>
    %592 = vector.broadcast %591 : vector<1x128xf32> to vector<10x128xf32>
    %c9_259 = arith.constant 9 : index
    %c0_260 = arith.constant 0 : index
    %c0_261 = arith.constant 0 : index
    %593 = vector.load %arg10[%c9_259, %c0_260, %c0_261] : memref<10x10x128xf32, #tpu.memory_space<vmem>>, vector<1x10x128xf32>
    %594 = vector.shape_cast %593 : vector<1x10x128xf32> to vector<10x128xf32>
    %595 = arith.mulf %594, %592 : vector<10x128xf32>
    %596 = arith.addf %535, %541 : vector<10x128xf32>
    %597 = arith.addf %547, %553 : vector<10x128xf32>
    %598 = arith.addf %559, %565 : vector<10x128xf32>
    %599 = arith.addf %571, %577 : vector<10x128xf32>
    %600 = arith.addf %583, %589 : vector<10x128xf32>
    %601 = arith.addf %596, %597 : vector<10x128xf32>
    %602 = arith.addf %598, %599 : vector<10x128xf32>
    %603 = arith.addf %600, %595 : vector<10x128xf32>
    %604 = arith.addf %601, %602 : vector<10x128xf32>
    %605 = arith.addf %604, %603 : vector<10x128xf32>
    %606 = math.tanh %605 : vector<10x128xf32>
    %607 = arith.index_cast %c5_i32_229 : i32 to index
    %c0_262 = arith.constant 0 : index
    %c0_263 = arith.constant 0 : index
    %608 = vector.load %arg9[%607, %c0_262, %c0_263] : memref<8x10x128xf32, #tpu.memory_space<vmem>>, vector<1x10x128xf32>
    %609 = vector.shape_cast %608 : vector<1x10x128xf32> to vector<10x128xf32>
    %610 = vector.shape_cast %606 : vector<10x128xf32> to vector<1x10x128xf32>
    tpu.vector_store %arg9[%607, %c0_262, %c0_263], %610 {strides = array<i32>} : memref<8x10x128xf32, #tpu.memory_space<vmem>>, vector<1x10x128xf32>,
    %c6_i32_264 = arith.constant 6 : i32
    %611 = arith.index_cast %c6_i32_264 : i32 to index
    %c0_265 = arith.constant 0 : index
    %c0_266 = arith.constant 0 : index
    %612 = vector.load %arg9[%611, %c0_265, %c0_266] : memref<8x10x128xf32, #tpu.memory_space<vmem>>, vector<1x10x128xf32>
    %613 = vector.shape_cast %612 : vector<1x10x128xf32> to vector<10x128xf32>
    %614 = vector.extract_strided_slice %606 {offsets = [0, 0], sizes = [1, 128], strides = [1, 1]} : vector<10x128xf32> to vector<1x128xf32>
    %615 = vector.shape_cast %614 : vector<1x128xf32> to vector<1x128xf32>
    %616 = vector.broadcast %615 : vector<1x128xf32> to vector<10x128xf32>
    %c0_267 = arith.constant 0 : index
    %c0_268 = arith.constant 0 : index
    %c0_269 = arith.constant 0 : index
    %617 = vector.load %arg10[%c0_267, %c0_268, %c0_269] : memref<10x10x128xf32, #tpu.memory_space<vmem>>, vector<1x10x128xf32>
    %618 = vector.shape_cast %617 : vector<1x10x128xf32> to vector<10x128xf32>
    %619 = arith.mulf %618, %616 : vector<10x128xf32>
    %620 = vector.extract_strided_slice %606 {offsets = [1, 0], sizes = [1, 128], strides = [1, 1]} : vector<10x128xf32> to vector<1x128xf32>
    %621 = vector.shape_cast %620 : vector<1x128xf32> to vector<1x128xf32>
    %622 = vector.broadcast %621 : vector<1x128xf32> to vector<10x128xf32>
    %c1_270 = arith.constant 1 : index
    %c0_271 = arith.constant 0 : index
    %c0_272 = arith.constant 0 : index
    %623 = vector.load %arg10[%c1_270, %c0_271, %c0_272] : memref<10x10x128xf32, #tpu.memory_space<vmem>>, vector<1x10x128xf32>
    %624 = vector.shape_cast %623 : vector<1x10x128xf32> to vector<10x128xf32>
    %625 = arith.mulf %624, %622 : vector<10x128xf32>
    %626 = vector.extract_strided_slice %606 {offsets = [2, 0], sizes = [1, 128], strides = [1, 1]} : vector<10x128xf32> to vector<1x128xf32>
    %627 = vector.shape_cast %626 : vector<1x128xf32> to vector<1x128xf32>
    %628 = vector.broadcast %627 : vector<1x128xf32> to vector<10x128xf32>
    %c2_273 = arith.constant 2 : index
    %c0_274 = arith.constant 0 : index
    %c0_275 = arith.constant 0 : index
    %629 = vector.load %arg10[%c2_273, %c0_274, %c0_275] : memref<10x10x128xf32, #tpu.memory_space<vmem>>, vector<1x10x128xf32>
    %630 = vector.shape_cast %629 : vector<1x10x128xf32> to vector<10x128xf32>
    %631 = arith.mulf %630, %628 : vector<10x128xf32>
    %632 = vector.extract_strided_slice %606 {offsets = [3, 0], sizes = [1, 128], strides = [1, 1]} : vector<10x128xf32> to vector<1x128xf32>
    %633 = vector.shape_cast %632 : vector<1x128xf32> to vector<1x128xf32>
    %634 = vector.broadcast %633 : vector<1x128xf32> to vector<10x128xf32>
    %c3_276 = arith.constant 3 : index
    %c0_277 = arith.constant 0 : index
    %c0_278 = arith.constant 0 : index
    %635 = vector.load %arg10[%c3_276, %c0_277, %c0_278] : memref<10x10x128xf32, #tpu.memory_space<vmem>>, vector<1x10x128xf32>
    %636 = vector.shape_cast %635 : vector<1x10x128xf32> to vector<10x128xf32>
    %637 = arith.mulf %636, %634 : vector<10x128xf32>
    %638 = vector.extract_strided_slice %606 {offsets = [4, 0], sizes = [1, 128], strides = [1, 1]} : vector<10x128xf32> to vector<1x128xf32>
    %639 = vector.shape_cast %638 : vector<1x128xf32> to vector<1x128xf32>
    %640 = vector.broadcast %639 : vector<1x128xf32> to vector<10x128xf32>
    %c4_279 = arith.constant 4 : index
    %c0_280 = arith.constant 0 : index
    %c0_281 = arith.constant 0 : index
    %641 = vector.load %arg10[%c4_279, %c0_280, %c0_281] : memref<10x10x128xf32, #tpu.memory_space<vmem>>, vector<1x10x128xf32>
    %642 = vector.shape_cast %641 : vector<1x10x128xf32> to vector<10x128xf32>
    %643 = arith.mulf %642, %640 : vector<10x128xf32>
    %644 = vector.extract_strided_slice %606 {offsets = [5, 0], sizes = [1, 128], strides = [1, 1]} : vector<10x128xf32> to vector<1x128xf32>
    %645 = vector.shape_cast %644 : vector<1x128xf32> to vector<1x128xf32>
    %646 = vector.broadcast %645 : vector<1x128xf32> to vector<10x128xf32>
    %c5_282 = arith.constant 5 : index
    %c0_283 = arith.constant 0 : index
    %c0_284 = arith.constant 0 : index
    %647 = vector.load %arg10[%c5_282, %c0_283, %c0_284] : memref<10x10x128xf32, #tpu.memory_space<vmem>>, vector<1x10x128xf32>
    %648 = vector.shape_cast %647 : vector<1x10x128xf32> to vector<10x128xf32>
    %649 = arith.mulf %648, %646 : vector<10x128xf32>
    %650 = vector.extract_strided_slice %606 {offsets = [6, 0], sizes = [1, 128], strides = [1, 1]} : vector<10x128xf32> to vector<1x128xf32>
    %651 = vector.shape_cast %650 : vector<1x128xf32> to vector<1x128xf32>
    %652 = vector.broadcast %651 : vector<1x128xf32> to vector<10x128xf32>
    %c6_285 = arith.constant 6 : index
    %c0_286 = arith.constant 0 : index
    %c0_287 = arith.constant 0 : index
    %653 = vector.load %arg10[%c6_285, %c0_286, %c0_287] : memref<10x10x128xf32, #tpu.memory_space<vmem>>, vector<1x10x128xf32>
    %654 = vector.shape_cast %653 : vector<1x10x128xf32> to vector<10x128xf32>
    %655 = arith.mulf %654, %652 : vector<10x128xf32>
    %656 = vector.extract_strided_slice %606 {offsets = [7, 0], sizes = [1, 128], strides = [1, 1]} : vector<10x128xf32> to vector<1x128xf32>
    %657 = vector.shape_cast %656 : vector<1x128xf32> to vector<1x128xf32>
    %658 = vector.broadcast %657 : vector<1x128xf32> to vector<10x128xf32>
    %c7_288 = arith.constant 7 : index
    %c0_289 = arith.constant 0 : index
    %c0_290 = arith.constant 0 : index
    %659 = vector.load %arg10[%c7_288, %c0_289, %c0_290] : memref<10x10x128xf32, #tpu.memory_space<vmem>>, vector<1x10x128xf32>
    %660 = vector.shape_cast %659 : vector<1x10x128xf32> to vector<10x128xf32>
    %661 = arith.mulf %660, %658 : vector<10x128xf32>
    %662 = vector.extract_strided_slice %606 {offsets = [8, 0], sizes = [1, 128], strides = [1, 1]} : vector<10x128xf32> to vector<1x128xf32>
    %663 = vector.shape_cast %662 : vector<1x128xf32> to vector<1x128xf32>
    %664 = vector.broadcast %663 : vector<1x128xf32> to vector<10x128xf32>
    %c8_291 = arith.constant 8 : index
    %c0_292 = arith.constant 0 : index
    %c0_293 = arith.constant 0 : index
    %665 = vector.load %arg10[%c8_291, %c0_292, %c0_293] : memref<10x10x128xf32, #tpu.memory_space<vmem>>, vector<1x10x128xf32>
    %666 = vector.shape_cast %665 : vector<1x10x128xf32> to vector<10x128xf32>
    %667 = arith.mulf %666, %664 : vector<10x128xf32>
    %668 = vector.extract_strided_slice %606 {offsets = [9, 0], sizes = [1, 128], strides = [1, 1]} : vector<10x128xf32> to vector<1x128xf32>
    %669 = vector.shape_cast %668 : vector<1x128xf32> to vector<1x128xf32>
    %670 = vector.broadcast %669 : vector<1x128xf32> to vector<10x128xf32>
    %c9_294 = arith.constant 9 : index
    %c0_295 = arith.constant 0 : index
    %c0_296 = arith.constant 0 : index
    %671 = vector.load %arg10[%c9_294, %c0_295, %c0_296] : memref<10x10x128xf32, #tpu.memory_space<vmem>>, vector<1x10x128xf32>
    %672 = vector.shape_cast %671 : vector<1x10x128xf32> to vector<10x128xf32>
    %673 = arith.mulf %672, %670 : vector<10x128xf32>
    %674 = arith.addf %613, %619 : vector<10x128xf32>
    %675 = arith.addf %625, %631 : vector<10x128xf32>
    %676 = arith.addf %637, %643 : vector<10x128xf32>
    %677 = arith.addf %649, %655 : vector<10x128xf32>
    %678 = arith.addf %661, %667 : vector<10x128xf32>
    %679 = arith.addf %674, %675 : vector<10x128xf32>
    %680 = arith.addf %676, %677 : vector<10x128xf32>
    %681 = arith.addf %678, %673 : vector<10x128xf32>
    %682 = arith.addf %679, %680 : vector<10x128xf32>
    %683 = arith.addf %682, %681 : vector<10x128xf32>
    %684 = math.tanh %683 : vector<10x128xf32>
    %685 = arith.index_cast %c6_i32_264 : i32 to index
    %c0_297 = arith.constant 0 : index
    %c0_298 = arith.constant 0 : index
    %686 = vector.load %arg9[%685, %c0_297, %c0_298] : memref<8x10x128xf32, #tpu.memory_space<vmem>>, vector<1x10x128xf32>
    %687 = vector.shape_cast %686 : vector<1x10x128xf32> to vector<10x128xf32>
    %688 = vector.shape_cast %684 : vector<10x128xf32> to vector<1x10x128xf32>
    tpu.vector_store %arg9[%685, %c0_297, %c0_298], %688 {strides = array<i32>} : memref<8x10x128xf32, #tpu.memory_space<vmem>>, vector<1x10x128xf32>,
    %c7_i32_299 = arith.constant 7 : i32
    %689 = arith.index_cast %c7_i32_299 : i32 to index
    %c0_300 = arith.constant 0 : index
    %c0_301 = arith.constant 0 : index
    %690 = vector.load %arg9[%689, %c0_300, %c0_301] : memref<8x10x128xf32, #tpu.memory_space<vmem>>, vector<1x10x128xf32>
    %691 = vector.shape_cast %690 : vector<1x10x128xf32> to vector<10x128xf32>
    %692 = vector.extract_strided_slice %684 {offsets = [0, 0], sizes = [1, 128], strides = [1, 1]} : vector<10x128xf32> to vector<1x128xf32>
    %693 = vector.shape_cast %692 : vector<1x128xf32> to vector<1x128xf32>
    %694 = vector.broadcast %693 : vector<1x128xf32> to vector<10x128xf32>
    %c0_302 = arith.constant 0 : index
    %c0_303 = arith.constant 0 : index
    %c0_304 = arith.constant 0 : index
    %695 = vector.load %arg10[%c0_302, %c0_303, %c0_304] : memref<10x10x128xf32, #tpu.memory_space<vmem>>, vector<1x10x128xf32>
    %696 = vector.shape_cast %695 : vector<1x10x128xf32> to vector<10x128xf32>
    %697 = arith.mulf %696, %694 : vector<10x128xf32>
    %698 = vector.extract_strided_slice %684 {offsets = [1, 0], sizes = [1, 128], strides = [1, 1]} : vector<10x128xf32> to vector<1x128xf32>
    %699 = vector.shape_cast %698 : vector<1x128xf32> to vector<1x128xf32>
    %700 = vector.broadcast %699 : vector<1x128xf32> to vector<10x128xf32>
    %c1_305 = arith.constant 1 : index
    %c0_306 = arith.constant 0 : index
    %c0_307 = arith.constant 0 : index
    %701 = vector.load %arg10[%c1_305, %c0_306, %c0_307] : memref<10x10x128xf32, #tpu.memory_space<vmem>>, vector<1x10x128xf32>
    %702 = vector.shape_cast %701 : vector<1x10x128xf32> to vector<10x128xf32>
    %703 = arith.mulf %702, %700 : vector<10x128xf32>
    %704 = vector.extract_strided_slice %684 {offsets = [2, 0], sizes = [1, 128], strides = [1, 1]} : vector<10x128xf32> to vector<1x128xf32>
    %705 = vector.shape_cast %704 : vector<1x128xf32> to vector<1x128xf32>
    %706 = vector.broadcast %705 : vector<1x128xf32> to vector<10x128xf32>
    %c2_308 = arith.constant 2 : index
    %c0_309 = arith.constant 0 : index
    %c0_310 = arith.constant 0 : index
    %707 = vector.load %arg10[%c2_308, %c0_309, %c0_310] : memref<10x10x128xf32, #tpu.memory_space<vmem>>, vector<1x10x128xf32>
    %708 = vector.shape_cast %707 : vector<1x10x128xf32> to vector<10x128xf32>
    %709 = arith.mulf %708, %706 : vector<10x128xf32>
    %710 = vector.extract_strided_slice %684 {offsets = [3, 0], sizes = [1, 128], strides = [1, 1]} : vector<10x128xf32> to vector<1x128xf32>
    %711 = vector.shape_cast %710 : vector<1x128xf32> to vector<1x128xf32>
    %712 = vector.broadcast %711 : vector<1x128xf32> to vector<10x128xf32>
    %c3_311 = arith.constant 3 : index
    %c0_312 = arith.constant 0 : index
    %c0_313 = arith.constant 0 : index
    %713 = vector.load %arg10[%c3_311, %c0_312, %c0_313] : memref<10x10x128xf32, #tpu.memory_space<vmem>>, vector<1x10x128xf32>
    %714 = vector.shape_cast %713 : vector<1x10x128xf32> to vector<10x128xf32>
    %715 = arith.mulf %714, %712 : vector<10x128xf32>
    %716 = vector.extract_strided_slice %684 {offsets = [4, 0], sizes = [1, 128], strides = [1, 1]} : vector<10x128xf32> to vector<1x128xf32>
    %717 = vector.shape_cast %716 : vector<1x128xf32> to vector<1x128xf32>
    %718 = vector.broadcast %717 : vector<1x128xf32> to vector<10x128xf32>
    %c4_314 = arith.constant 4 : index
    %c0_315 = arith.constant 0 : index
    %c0_316 = arith.constant 0 : index
    %719 = vector.load %arg10[%c4_314, %c0_315, %c0_316] : memref<10x10x128xf32, #tpu.memory_space<vmem>>, vector<1x10x128xf32>
    %720 = vector.shape_cast %719 : vector<1x10x128xf32> to vector<10x128xf32>
    %721 = arith.mulf %720, %718 : vector<10x128xf32>
    %722 = vector.extract_strided_slice %684 {offsets = [5, 0], sizes = [1, 128], strides = [1, 1]} : vector<10x128xf32> to vector<1x128xf32>
    %723 = vector.shape_cast %722 : vector<1x128xf32> to vector<1x128xf32>
    %724 = vector.broadcast %723 : vector<1x128xf32> to vector<10x128xf32>
    %c5_317 = arith.constant 5 : index
    %c0_318 = arith.constant 0 : index
    %c0_319 = arith.constant 0 : index
    %725 = vector.load %arg10[%c5_317, %c0_318, %c0_319] : memref<10x10x128xf32, #tpu.memory_space<vmem>>, vector<1x10x128xf32>
    %726 = vector.shape_cast %725 : vector<1x10x128xf32> to vector<10x128xf32>
    %727 = arith.mulf %726, %724 : vector<10x128xf32>
    %728 = vector.extract_strided_slice %684 {offsets = [6, 0], sizes = [1, 128], strides = [1, 1]} : vector<10x128xf32> to vector<1x128xf32>
    %729 = vector.shape_cast %728 : vector<1x128xf32> to vector<1x128xf32>
    %730 = vector.broadcast %729 : vector<1x128xf32> to vector<10x128xf32>
    %c6_320 = arith.constant 6 : index
    %c0_321 = arith.constant 0 : index
    %c0_322 = arith.constant 0 : index
    %731 = vector.load %arg10[%c6_320, %c0_321, %c0_322] : memref<10x10x128xf32, #tpu.memory_space<vmem>>, vector<1x10x128xf32>
    %732 = vector.shape_cast %731 : vector<1x10x128xf32> to vector<10x128xf32>
    %733 = arith.mulf %732, %730 : vector<10x128xf32>
    %734 = vector.extract_strided_slice %684 {offsets = [7, 0], sizes = [1, 128], strides = [1, 1]} : vector<10x128xf32> to vector<1x128xf32>
    %735 = vector.shape_cast %734 : vector<1x128xf32> to vector<1x128xf32>
    %736 = vector.broadcast %735 : vector<1x128xf32> to vector<10x128xf32>
    %c7_323 = arith.constant 7 : index
    %c0_324 = arith.constant 0 : index
    %c0_325 = arith.constant 0 : index
    %737 = vector.load %arg10[%c7_323, %c0_324, %c0_325] : memref<10x10x128xf32, #tpu.memory_space<vmem>>, vector<1x10x128xf32>
    %738 = vector.shape_cast %737 : vector<1x10x128xf32> to vector<10x128xf32>
    %739 = arith.mulf %738, %736 : vector<10x128xf32>
    %740 = vector.extract_strided_slice %684 {offsets = [8, 0], sizes = [1, 128], strides = [1, 1]} : vector<10x128xf32> to vector<1x128xf32>
    %741 = vector.shape_cast %740 : vector<1x128xf32> to vector<1x128xf32>
    %742 = vector.broadcast %741 : vector<1x128xf32> to vector<10x128xf32>
    %c8_326 = arith.constant 8 : index
    %c0_327 = arith.constant 0 : index
    %c0_328 = arith.constant 0 : index
    %743 = vector.load %arg10[%c8_326, %c0_327, %c0_328] : memref<10x10x128xf32, #tpu.memory_space<vmem>>, vector<1x10x128xf32>
    %744 = vector.shape_cast %743 : vector<1x10x128xf32> to vector<10x128xf32>
    %745 = arith.mulf %744, %742 : vector<10x128xf32>
    %746 = vector.extract_strided_slice %684 {offsets = [9, 0], sizes = [1, 128], strides = [1, 1]} : vector<10x128xf32> to vector<1x128xf32>
    %747 = vector.shape_cast %746 : vector<1x128xf32> to vector<1x128xf32>
    %748 = vector.broadcast %747 : vector<1x128xf32> to vector<10x128xf32>
    %c9_329 = arith.constant 9 : index
    %c0_330 = arith.constant 0 : index
    %c0_331 = arith.constant 0 : index
    %749 = vector.load %arg10[%c9_329, %c0_330, %c0_331] : memref<10x10x128xf32, #tpu.memory_space<vmem>>, vector<1x10x128xf32>
    %750 = vector.shape_cast %749 : vector<1x10x128xf32> to vector<10x128xf32>
    %751 = arith.mulf %750, %748 : vector<10x128xf32>
    %752 = arith.addf %691, %697 : vector<10x128xf32>
    %753 = arith.addf %703, %709 : vector<10x128xf32>
    %754 = arith.addf %715, %721 : vector<10x128xf32>
    %755 = arith.addf %727, %733 : vector<10x128xf32>
    %756 = arith.addf %739, %745 : vector<10x128xf32>
    %757 = arith.addf %752, %753 : vector<10x128xf32>
    %758 = arith.addf %754, %755 : vector<10x128xf32>
    %759 = arith.addf %756, %751 : vector<10x128xf32>
    %760 = arith.addf %757, %758 : vector<10x128xf32>
    %761 = arith.addf %760, %759 : vector<10x128xf32>
    %762 = math.tanh %761 : vector<10x128xf32>
    %763 = arith.index_cast %c7_i32_299 : i32 to index
    %c0_332 = arith.constant 0 : index
    %c0_333 = arith.constant 0 : index
    %764 = vector.load %arg9[%763, %c0_332, %c0_333] : memref<8x10x128xf32, #tpu.memory_space<vmem>>, vector<1x10x128xf32>
    %765 = vector.shape_cast %764 : vector<1x10x128xf32> to vector<10x128xf32>
    %766 = vector.shape_cast %762 : vector<10x128xf32> to vector<1x10x128xf32>
    tpu.vector_store %arg9[%763, %c0_332, %c0_333], %766 {strides = array<i32>} : memref<8x10x128xf32, #tpu.memory_space<vmem>>, vector<1x10x128xf32>,
    %c8_i32_334 = arith.constant 8 : i32
    %c0_335 = arith.constant 0 : index
    %c0_336 = arith.constant 0 : index
    %767 = vector.load %arg11[%c0_335, %c0_336] : memref<10x128xf32, #tpu.memory_space<vmem>>, vector<10x128xf32>
    tpu.vector_store %arg11[%c0_335, %c0_336], %762 {strides = array<i32>} : memref<10x128xf32, #tpu.memory_space<vmem>>, vector<10x128xf32>,
    %c0_337 = arith.constant 0 : index
    %c0_338 = arith.constant 0 : index
    %768 = vector.load %arg6[%c0_337, %c0_338] : memref<10x1xf32, #tpu.memory_space<vmem>>, vector<10x1xf32>
    %769 = vector.shape_cast %768 : vector<10x1xf32> to vector<10x1xf32>
    %770 = vector.broadcast %769 : vector<10x1xf32> to vector<10x128xf32>
    %c0_339 = arith.constant 0 : index
    %c0_340 = arith.constant 0 : index
    %771 = vector.load %arg7[%c0_339, %c0_340] : memref<1x1xf32, #tpu.memory_space<vmem>>, vector<1x1xf32>
    %772 = vector.extract %771[0, 0] : f32 from vector<1x1xf32>
    %c0_i32_341 = arith.constant 0 : i32
    %c8_i32_342 = arith.constant 8 : i32
    %773 = arith.muli %c0_i32_341, %c8_i32_342 : i32
    %774 = tpu.assume_multiple %773, 8 : i32
    %775 = arith.index_cast %774 : i32 to index
    %c0_343 = arith.constant 0 : index
    %c0_344 = arith.constant 0 : index
    %776 = vector.load %arg9[%775, %c0_343, %c0_344] : memref<8x10x128xf32, #tpu.memory_space<vmem>>, vector<8x10x128xf32>
    %777 = vector.shape_cast %770 : vector<10x128xf32> to vector<1x10x128xf32>
    %778 = vector.broadcast %777 : vector<1x10x128xf32> to vector<8x10x128xf32>
    %779 = arith.mulf %776, %778 : vector<8x10x128xf32>
    %cst = arith.constant dense<0.000000e+00> : vector<8x128xf32>
    %780 = vector.multi_reduction <add>, %779, %cst [1] : vector<8x10x128xf32> to vector<8x128xf32>
    %781 = vector.broadcast %772 : f32 to vector<8x128xf32>
    %782 = arith.addf %780, %781 : vector<8x128xf32>
    %783 = arith.index_cast %774 : i32 to index
    %c0_345 = arith.constant 0 : index
    %784 = vector.load %arg8[%783, %c0_345] : memref<8x128xf32, #tpu.memory_space<vmem>>, vector<8x128xf32>
    tpu.vector_store %arg8[%783, %c0_345], %782 {strides = array<i32>} : memref<8x128xf32, #tpu.memory_space<vmem>>, vector<8x128xf32>,
    %c1_i32_346 = arith.constant 1 : i32
    return
  }
  func.func @transform_0(%arg0: i32, %arg1: i32) -> (i32, i32) {
    %c0_i32 = arith.constant 0 : i32
    return %arg1, %arg0 : i32, i32
  }
  func.func @transform_1(%arg0: i32, %arg1: i32) -> (i32, i32) {
    %c0_i32 = arith.constant 0 : i32
    %c0_i32_0 = arith.constant 0 : i32
    %c0_i32_1 = arith.constant 0 : i32
    return %c0_i32, %c0_i32_0 : i32, i32
  }
  func.func @transform_2(%arg0: i32, %arg1: i32) -> (i32, i32) {
    %c0_i32 = arith.constant 0 : i32
    %c0_i32_0 = arith.constant 0 : i32
    %c0_i32_1 = arith.constant 0 : i32
    return %c0_i32, %c0_i32_0 : i32, i32
  }
  func.func @transform_3(%arg0: i32, %arg1: i32) -> (i32, i32) {
    %c0_i32 = arith.constant 0 : i32
    %c0_i32_0 = arith.constant 0 : i32
    %c0_i32_1 = arith.constant 0 : i32
    return %c0_i32, %c0_i32_0 : i32, i32
  }
  func.func @transform_4(%arg0: i32, %arg1: i32) -> (i32, i32) {
    %c0_i32 = arith.constant 0 : i32
    %c0_i32_0 = arith.constant 0 : i32
    %c0_i32_1 = arith.constant 0 : i32
    return %c0_i32, %c0_i32_0 : i32, i32
  }
  func.func @transform_5(%arg0: i32, %arg1: i32) -> (i32, i32) {
    %c0_i32 = arith.constant 0 : i32
    %c0_i32_0 = arith.constant 0 : i32
    %c0_i32_1 = arith.constant 0 : i32
    return %c0_i32, %c0_i32_0 : i32, i32
  }
  func.func @transform_6(%arg0: i32, %arg1: i32) -> (i32, i32) {
    %c0_i32 = arith.constant 0 : i32
    return %arg1, %arg0 : i32, i32
  }
}

</mosaic_0001>

<bundles_post_ra>
// kernel: tpu_custom_call.1
= control target key start
LH: loop header
LB: loop body
LE: loop exit
PB: predicated region body
PF: predicated region fallthrough
CT: control target
= control target key end

     0   :  { %s1889_s0 = inlined_call_operand.vmem [shape: f32[8,128], index: 0, kind: input, shape index: {}]   ;;  %s1890_s1 = inlined_call_operand.vmem [shape: f32[10,1], index: 1, kind: input, shape index: {}]   ;;  %s1891_s2 = inlined_call_operand.vmem [shape: f32[10,10], index: 2, kind: input, shape index: {}]   ;;  %s1892_s3 = inlined_call_operand.vmem [shape: f32[10,1], index: 3, kind: input, shape index: {}]   ;;  %s1893_s4 = inlined_call_operand.vmem [shape: f32[10,1], index: 4, kind: input, shape index: {}]   ;;  %s1894_s5 = inlined_call_operand.<no memory space> [shape: f32[1,1], index: 5, kind: input, shape index: {}]   ;;  %s1895_s6 = inlined_call_operand.hbm [shape: f32[8,128], index: 6, kind: output, shape index: {}]  }
   0x1   :  { %v11_v0 = vstv %s1894_s5 }
   0x2   :  { %12 = vst [vmem:[#allocation5] sm:$0x1] %v11_v0 }
   0x3   :  { %v32_v1 = vld [vmem:[%s1891_s2] sm:$0xff]  ;;  %v1384_v2 = vmov 3   ;;  %v1385_v3 = vmov 1   ;;  %v33_v4 = vld [vmem:[%s1891_s2 + $0x8] sm:$0x3]  ;;  %v1386_v5 = vmov 0.0  }
   0x4   :  { %1300 = vset.pattern.permute.xlu0 %v1384_v2  ;;  %1298 = vset.pattern.permute.xlu1 %v1385_v3  ;;  %31 = vst [vmem:[#allocation4 + $0x8] sm:$0x3] %v1386_v5 }
   0x5   :  { %69 = vperm.xlu0 %1300, %v32_v1   ;;  %47 = vperm.xlu1 %1298, %v32_v1  }
   0x6   :  { %13 = vsyncpa [#allocation7], 0  ;;  %v1387_v6 = vmov 2   ;;  %v1388_v7 = vmov 6   ;;  %v1389_v8 = vmov 4   ;;  %v1390_v9 = vmov 5  }
   0x7   :  { %v145_v10 = vld [vmem:[%s1890_s1] sm:$0xff]  ;;  %v1391_v11 = vmov 0   ;;  %v146_v12 = vld [vmem:[%s1890_s1 + $0x8] sm:$0x3]  ;;  %v1392_v15 = vmov 9   ;;  %v1393_v17 = vmov 7  }
   0x8   :  { %v157_v13 = vld [vmem:[%s1892_s3] sm:$0xff]  ;;  %v158_v14 = vld [vmem:[%s1892_s3 + $0x8] sm:$0x3]  ;;  %v1394_v18 = vmov 8   ;;  %vm1164_vm0 = vcmask 1041408   ;;  %vm1246_vm1 = vcmask 1041409  }
   0x9   :  { %73 = vperm.xlu0 %1300, %v33_v4   ;;  %1299 = vset.pattern.permute.xlu1 %v1387_v6  ;;  %v1116_v16 = vld [vmem:[%s1893_s4] sm:$0xff]  ;;  %v1118_v19 = vld [vmem:[#allocation5] sm:$0x1]  ;;  %v1117_v20 = vld [vmem:[%s1893_s4 + $0x8] sm:$0x3]  ;;  %vm1248_vm2 = vcmask 1042434  }
   0xa   :  { %58 = vperm.xlu1 %1299, %v32_v1   ;;  %1284 = vpush %v1118_v19  ;;  %v1277_v29 = vld [vmem:[%s1889_s0 + $0x1] ss:$0 sm:$0xff]  ;;  %v1278_v30 = vld [vmem:[%s1889_s0 + $0x2] ss:$0 sm:$0xff]  ;;  %v1279_v31 = vld [vmem:[%s1889_s0 + $0x3] ss:$0 sm:$0xff] }
   0xb   :  { %v1280_v33 = vld [vmem:[%s1889_s0 + $0x4] ss:$0 sm:$0xff]  ;;  %v1281_v34 = vld [vmem:[%s1889_s0 + $0x5] ss:$0 sm:$0xff]  ;;  %v1282_v35 = vld [vmem:[%s1889_s0 + $0x6] ss:$0 sm:$0xff] }
   0xc   :  { %v1283_v39 = vld [vmem:[%s1889_s0 + $0x7] ss:$0 sm:$0xff]  ;;  %v1276_v50 = vld [vmem:[%s1889_s0] ss:$0 sm:$0xff]  ;;  %vm1250_vm3 = vcmask 1043459   ;;  %vm1252_vm4 = vcmask 1044484  }
   0xd   :  { %1306 = vset.pattern.permute.xlu0 %v1388_v7  ;;  %vm1254_vm5 = vcmask 1045509   ;;  %vm1256_vm6 = vcmask 1046534   ;;  %s1395_s26 = smov [#allocation6]   ;;  %vm1258_vm7 = vcmask 1047559  }
   0xe   :  { %102 = vperm.xlu0 %1306, %v32_v1   ;;  %1301 = vset.pattern.permute.xlu1 %v1389_v8  ;;  %s1268_s5 = sshll.u32 %s1395_s26, 4  ;;  %s1269_s5 = int_to_ptr.vmem [resolvable:$true] %s1268_s5 }
   0xf   :  { %80 = vperm.xlu1 %1301, %v32_v1   ;;  %s1360_s2 = scalar_lea.vmem %s1269_s5, 128  ;;  %p1365_p1 = scmp.lt.s32.totalorder %s1269_s5, %s1269_s5 }
  0x10   :  { %p1361_p0 = scmp.ne.s32.totalorder %s1269_s5, %s1360_s2  ;;  %p1366_p2 = scmp.lt.s32.totalorder %s1360_s2, %s1360_s2 }
  0x12   :  { %106 = vperm.xlu0 %1306, %v33_v4   ;;  %p1367_p3 = por %p1366_p2, %p1365_p1 }
  0x13   :  { %1302 = vset.pattern.permute.xlu1 %v1390_v9 }
  0x14   :  { %91 = vperm.xlu1 %1302, %v32_v1   ;;  %p1368_p4 = pnand %p1367_p3, %p1361_p0 }
  0x16   :  { %1309 = vset.pattern.permute.xlu0 %v1391_v11 }
  0x17   :  { %149 = vperm.xlu0 %1309, %v145_v10  }
  0x18   :  { %1303 = vset.pattern.permute.xlu1 %v1391_v11 }
  0x19   :  { %154 = vperm.xlu1 %1303, %v146_v12  }
  0x1b   :  { %36 = vperm.xlu0 %1309, %v32_v1  }
  0x1d   :  { %161 = vperm.xlu1 %1303, %v157_v13  }
  0x1f   :  { %41 = vperm.xlu0 %1309, %v33_v4  }
  0x21   :  { %1304 = vset.pattern.permute.xlu1 %v1385_v3 }
  0x22   :  { %51 = vperm.xlu1 %1304, %v33_v4  }
  0x23   :  { %166 = vperm.xlu0 %1309, %v158_v14  }
  0x26   :  { %1305 = vset.pattern.permute.xlu1 %v1387_v6 }
  0x27   :  { %62 = vperm.xlu1 %1305, %v33_v4   ;;  %1314 = vset.pattern.permute.xlu0 %v1392_v15 }
  0x28   :  { %135 = vperm.xlu0 %1314, %v32_v1  }
  0x2b   :  { %1307 = vset.pattern.permute.xlu1 %v1389_v8 }
  0x2c   :  { %84 = vperm.xlu1 %1307, %v33_v4   ;;  %1317 = vset.pattern.permute.xlu0 %v1391_v11 }
  0x2d   :  { %1140 = vperm.xlu0 %1317, %v1116_v16  }
  0x30   :  { %1308 = vset.pattern.permute.xlu1 %v1390_v9 }
  0x31   :  { %95 = vperm.xlu1 %1308, %v33_v4  }
  0x35   :  { %1310 = vset.pattern.permute.xlu1 %v1393_v17 }
  0x36   :  { %113 = vperm.xlu1 %1310, %v32_v1  }
  0x3a   :  { %1311 = vset.pattern.permute.xlu1 %v1394_v18 }
  0x3b   :  { %124 = vperm.xlu1 %1311, %v32_v1   ;;  %s1285_s0 = spop %1284 }
  0x3f   :  { %1312 = vset.pattern.permute.xlu1 %v1393_v17 }
  0x40   :  { %117 = vperm.xlu1 %1312, %v33_v4  }
  0x44   :  { %1313 = vset.pattern.permute.xlu1 %v1394_v18 }
  0x45   :  { %128 = vperm.xlu1 %1313, %v33_v4  }
  0x49   :  { %1315 = vset.pattern.permute.xlu1 %v1392_v15 }
  0x4a   :  { %139 = vperm.xlu1 %1315, %v33_v4  }
  0x4e   :  { %1316 = vset.pattern.permute.xlu1 %v1391_v11  ;;  %v268_v11 = vlaneseq }
  0x4f   :  { %1145 = vperm.xlu1 %1316, %v1117_v20  }
  0x50   :  { %v269_v14 = vshrl.u32 %v268_v11, 7 }
  0x52   :  { %v1539_v15 = vsub.s32 0, %v269_v14  ;;  %v1541_v17 = vsub.s32 2, %v269_v14  ;;  %v1543_v18 = vsub.s32 6, %v269_v14  ;;  %v1545_v19 = vsub.s32 5, %v269_v14 }
  0x53   :  { %v1547_v20 = vsub.s32 3, %v269_v14 }
  0x84   :  { %v1459_v21 = vpop.permute.xlu1 %47  ;;  %v1461_v22 = vpop.permute.xlu0 %69 }
  0x85   :  { %55 = vst [vmem:[#allocation3 + $0x10] sm:$0xff] %v1459_v21  ;;  %77 = vst [vmem:[#allocation3 + $0x30] sm:$0xff] %v1461_v22 }
  0x88   :  { %v74_v23 = vpop.permute.xlu0 %73 }
  0x89   :  { %v1465_v24 = vpop.permute.xlu1 %58  ;;  %78 = vst [vmem:[#allocation3 + $0x38] sm:$0x3] %v74_v23  ;;  %v1549_v23 = vsub.s32 4, %v269_v14 }
  0x8a   :  { %66 = vst [vmem:[#allocation3 + $0x20] sm:$0xff] %v1465_v24 }
  0x8d   :  { %v1468_v25 = vpop.permute.xlu0 %102 }
  0x8e   :  { %110 = vst [vmem:[#allocation3 + $0x60] sm:$0xff] %v1468_v25  ;;  %v1471_v26 = vpop.permute.xlu1 %80 }
  0x8f   :  { %88 = vst [vmem:[#allocation3 + $0x40] sm:$0xff] %v1471_v26 }
  0x91   :  { %v107_v27 = vpop.permute.xlu0 %106 }
  0x92   :  { %111 = vst [vmem:[#allocation3 + $0x68] sm:$0x3] %v107_v27  ;;  %v1551_v27 = vsub.s32 1, %v269_v14 }
  0x93   :  { %v1474_v28 = vpop.permute.xlu1 %91 }
  0x94   :  { %99 = vst [vmem:[#allocation3 + $0x50] sm:$0xff] %v1474_v28 }
  0x96   :  { %v1486_v32 = vpop.permute.xlu0 %149 }
  0x97   :  { %v185_v36 = vmul.f32 %v1277_v29, %v1486_v32  ;;  %v197_v37 = vmul.f32 %v1278_v30, %v1486_v32  ;;  %v209_v38 = vmul.f32 %v1279_v31, %v1486_v32  ;;  %v221_v40 = vmul.f32 %v1280_v33, %v1486_v32 }
  0x98   :  { %v233_v41 = vmul.f32 %v1281_v34, %v1486_v32  ;;  %v245_v42 = vmul.f32 %v1282_v35, %v1486_v32  ;;  %v155_v43 = vpop.permute.xlu1 %154  ;;  %v257_v44 = vmul.f32 %v1283_v39, %v1486_v32 }
  0x99   :  { %v175_v56 = vmul.f32 %v1276_v50, %v155_v43  ;;  %v186_v57 = vmul.f32 %v1277_v29, %v155_v43  ;;  %v198_v58 = vmul.f32 %v1278_v30, %v155_v43  ;;  %v210_v59 = vmul.f32 %v1279_v31, %v155_v43 }
  0x9a   :  { %v1507_v45 = vpop.permute.xlu0 %36  ;;  %v222_v61 = vmul.f32 %v1280_v33, %v155_v43  ;;  %v234_v62 = vmul.f32 %v1281_v34, %v155_v43  ;;  %v246_v63 = vmul.f32 %v1282_v35, %v155_v43  ;;  %v258_v0 = vmul.f32 %v1283_v39, %v155_v43 }
  0x9b   :  { %44 = vst [vmem:[#allocation3] sm:$0xff] %v1507_v45  ;;  %v174_v29 = vmul.f32 %v1276_v50, %v1486_v32  ;;  %v271_v30 = vrot.slane %v1386_v5, %v1539_v15  ;;  %v287_v33 = vrot.slane %v1386_v5, %v1541_v17  ;;  %v319_v34 = vrot.slane %v1386_v5, %v1543_v18 }
  0x9c   :  { %v1510_v46 = vpop.permute.xlu1 %161  ;;  %v311_v35 = vrot.slane %v1386_v5, %v1545_v19  ;;  %v303_v32 = vrot.slane %v1386_v5, %v1549_v23 }
  0x9d   :  { %v1513_v47 = vadd.f32 %v185_v36, %v1510_v46  ;;  %v1516_v48 = vadd.f32 %v197_v37, %v1510_v46  ;;  %v1519_v49 = vadd.f32 %v209_v38, %v1510_v46  ;;  %v1525_v51 = vadd.f32 %v221_v40, %v1510_v46 }
  0x9e   :  { %v1528_v52 = vadd.f32 %v233_v41, %v1510_v46  ;;  %v1531_v53 = vadd.f32 %v245_v42, %v1510_v46  ;;  %v1534_v54 = vadd.f32 %v257_v44, %v1510_v46  ;;  %v42_v55 = vpop.permute.xlu0 %41  ;;  %v295_v36 = vrot.slane %v1386_v5, %v1547_v20  ;;  %v265_v41 = vld [vmem:[#allocation4 + $0x8] sm:$0x3] }
  0x9f   :  { %45 = vst [vmem:[#allocation3 + $0x8] sm:$0x3] %v42_v55  ;;  %v1566_v37 = vsub.s32 7, %v269_v14  ;;  %v279_v38 = vrot.slane %v1386_v5, %v1551_v27  ;;  %v274_v39 = vmul.f32 %v271_v30, %v1507_v45  ;;  %v176_v40 = vadd.f32 %v174_v29, %v1510_v46 }
  0xa0   :  { %1896 = vst [vmem:[#allocation9_spill] sm:$0xff] %v1531_v53  ;;  %1897 = vst [vmem:[#allocation10_spill] sm:$0xff] %v1534_v54  ;;  %v290_v42 = vmul.f32 %v287_v33, %v1465_v24  ;;  %v322_v43 = vmul.f32 %v319_v34, %v1468_v25  ;;  %v314_v44 = vmul.f32 %v311_v35, %v1474_v28 }
  0xa1   :  { %v52_v60 = vpop.permute.xlu1 %51  ;;  %v298_v55 = vmul.f32 %v295_v36, %v1461_v22  ;;  %v282_v46 = vmul.f32 %v279_v38, %v1459_v21 }
  0xa2   :  { %56 = vst [vmem:[#allocation3 + $0x18] sm:$0x3] %v52_v60  ;;  %v167_v1 = vpop.permute.xlu0 %166  ;;  %v348_v60 = vadd.f32 %v274_v39, %v176_v40 }
  0xa3   :  { %v177_v2 = vadd.f32 %v175_v56, %v167_v1  ;;  %v188_v3 = vadd.f32 %v186_v57, %v167_v1  ;;  %v200_v4 = vadd.f32 %v198_v58, %v167_v1  ;;  %v212_v6 = vadd.f32 %v210_v59, %v167_v1 }
  0xa4   :  { %v224_v7 = vadd.f32 %v222_v61, %v167_v1  ;;  %v236_v8 = vadd.f32 %v234_v62, %v167_v1  ;;  %v248_v9 = vadd.f32 %v246_v63, %v167_v1  ;;  %v260_v10 = vadd.f32 %v258_v0, %v167_v1 }
  0xa5   :  { %179 = vst [vmem:[#allocation2 + $0x8] sm:$0x3] %v177_v2  ;;  %191 = vst [vmem:[#allocation2 + $0x18] sm:$0x3] %v188_v3  ;;  %v306_v56 = vmul.f32 %v303_v32, %v1471_v26  ;;  %v327_v57 = vrot.slane %v1386_v5, %v1566_v37  ;;  %v335_v58 = vrot.slane %v265_v41, %v1539_v15 }
  0xa6   :  { %203 = vst [vmem:[#allocation2 + $0x28] sm:$0x3] %v200_v4  ;;  %215 = vst [vmem:[#allocation2 + $0x38] sm:$0x3] %v212_v6  ;;  %v63_v12 = vpop.permute.xlu1 %62  ;;  %v343_v59 = vrot.slane %v265_v41, %v1551_v27  ;;  %v350_v61 = vadd.f32 %v290_v42, %v282_v46  ;;  %v354_v62 = vadd.f32 %v322_v43, %v314_v44  ;;  %v273_v40 = vld [vmem:[#allocation3 + $0x8] sm:$0x3] }
  0xa7   :  { %227 = vst [vmem:[#allocation2 + $0x48] sm:$0x3] %v224_v7  ;;  %239 = vst [vmem:[#allocation2 + $0x58] sm:$0x3] %v236_v8  ;;  %v1536_v13 = vpop.permute.xlu0 %135  ;;  %v352_v63 = vadd.f32 %v306_v56, %v298_v55  ;;  %v275_v46 = vmul.f32 %v273_v40, %v271_v30 }
  0xa8   :  { %251 = vst [vmem:[#allocation2 + $0x68] sm:$0x3] %v248_v9  ;;  %263 = vst [vmem:[#allocation2 + $0x78] sm:$0x3] %v260_v10  ;;  %v346_v5 = vmul.f32 %v343_v59, %v1536_v13  ;;  %v358_v3 = vadd.f32 %v350_v61, %v348_v60 }
  0xa9   :  { %67 = vst [vmem:[#allocation3 + $0x28] sm:$0x3] %v63_v12  ;;  %143 = vst [vmem:[#allocation3 + $0x90] sm:$0xff] %v1536_v13  ;;  %v360_v4 = vadd.f32 %v354_v62, %v352_v63  ;;  %v321_v12 = vld [vmem:[#allocation3 + $0x68] sm:$0x3] }
  0xaa   :  { %v323_v39 = vmul.f32 %v321_v12, %v319_v34  ;;  %v281_v41 = vld [vmem:[#allocation3 + $0x18] sm:$0x3] }
  0xab   :  { %v85_v16 = vpop.permute.xlu1 %84  ;;  %v364_v8 = vadd.f32 %v360_v4, %v358_v3  ;;  %v283_v60 = vmul.f32 %v281_v41, %v279_v38 }
  0xac   :  { %89 = vst [vmem:[#allocation3 + $0x48] sm:$0x3] %v85_v16  ;;  %v267_v61 = vld [vmem:[#allocation2 + $0x8] sm:$0x3] }
  0xad   :  { %v349_v30 = vadd.f32 %v275_v46, %v267_v61  ;;  %v379_v61 = vld [vmem:[#allocation3 + $0x8] sm:$0x3] }
  0xb0   :  { %v96_v31 = vpop.permute.xlu1 %95  ;;  %v289_v16 = vld [vmem:[#allocation3 + $0x28] sm:$0x3] }
  0xb1   :  { %100 = vst [vmem:[#allocation3 + $0x58] sm:$0x3] %v96_v31  ;;  %v297_v31 = vld [vmem:[#allocation3 + $0x38] sm:$0x3]  ;;  %v291_v43 = vmul.f32 %v289_v16, %v287_v33 }
  0xb2   :  { %v299_v56 = vmul.f32 %v297_v31, %v295_v36 }
  0xb3   :  { %v305_v29 = vld [vmem:[#allocation3 + $0x48] sm:$0x3] }
  0xb4   :  { %v307_v44 = vmul.f32 %v305_v29, %v303_v32 }
  0xb5   :  { %v1575_v50 = vpop.permute.xlu1 %113 }
  0xb6   :  { %121 = vst [vmem:[#allocation3 + $0x70] sm:$0xff] %v1575_v50  ;;  %v330_v1 = vmul.f32 %v327_v57, %v1575_v50 }
  0xb8   :  { %v313_v14 = vld [vmem:[#allocation3 + $0x58] sm:$0x3] }
  0xb9   :  { %v315_v42 = vmul.f32 %v313_v14, %v311_v35 }
  0xba   :  { %v1585_v0 = vpop.permute.xlu1 %124 }
  0xbb   :  { %132 = vst [vmem:[#allocation3 + $0x80] sm:$0xff] %v1585_v0  ;;  %v338_v2 = vmul.f32 %v335_v58, %v1585_v0  ;;  %v355_v62 = vadd.f32 %v323_v39, %v315_v42 }
  0xbd   :  { %v356_v6 = vadd.f32 %v338_v2, %v330_v1  ;;  %v351_v2 = vadd.f32 %v291_v43, %v283_v60  ;;  %v403_v60 = vld [vmem:[#allocation3 + $0x38] sm:$0x3] }
  0xbf   :  { %v362_v7 = vadd.f32 %v356_v6, %v346_v5  ;;  %v118_v9 = vpop.permute.xlu1 %117  ;;  %v353_v5 = vadd.f32 %v307_v44, %v299_v56 }
  0xc0   :  { %122 = vst [vmem:[#allocation3 + $0x78] sm:$0x3] %v118_v9 }
  0xc1   :  { %v366_v10 = vadd.f32 %v364_v8, %v362_v7  ;;  %v359_v8 = vadd.f32 %v351_v2, %v349_v30 }
  0xc3   :  { %1318 = vtanh.f32 %v366_v10 }
  0xc4   :  { %v129_v11 = vpop.permute.xlu1 %128 }
  0xc5   :  { %133 = vst [vmem:[#allocation3 + $0x88] sm:$0x3] %v129_v11 }
  0xc7   :  { %v329_v3 = vld [vmem:[#allocation3 + $0x78] sm:$0x3] }
  0xc8   :  { %v331_v6 = vmul.f32 %v329_v3, %v327_v57  ;;  %v411_v3 = vld [vmem:[#allocation3 + $0x48] sm:$0x3] }
  0xc9   :  { %v140_v55 = vpop.permute.xlu1 %139 }
  0xca   :  { %144 = vst [vmem:[#allocation3 + $0x98] sm:$0x3] %v140_v55 }
  0xcc   :  { %v337_v63 = vld [vmem:[#allocation3 + $0x88] sm:$0x3] }
  0xcd   :  { %v1591_v1 = vpop.eup %1318  ;;  %v339_v4 = vmul.f32 %v337_v63, %v335_v58  ;;  %v361_v58 = vadd.f32 %v355_v62, %v353_v5  ;;  %v387_v62 = vld [vmem:[#allocation3 + $0x18] sm:$0x3]  ;;  %v395_v63 = vld [vmem:[#allocation3 + $0x28] sm:$0x3] }
  0xce   :  { %v377_v34 = vrot.slane %v1591_v1, %v1539_v15  ;;  %v385_v33 = vrot.slane %v1591_v1, %v1551_v27  ;;  %v393_v35 = vrot.slane %v1591_v1, %v1541_v17  ;;  %v401_v36 = vrot.slane %v1591_v1, %v1547_v20  ;;  %v427_v5 = vld [vmem:[#allocation3 + $0x68] sm:$0x3] }
  0xcf   :  { %v409_v32 = vrot.slane %v1591_v1, %v1549_v23  ;;  %v417_v38 = vrot.slane %v1591_v1, %v1545_v19  ;;  %v357_v12 = vadd.f32 %v339_v4, %v331_v6  ;;  %v425_v39 = vrot.slane %v1591_v1, %v1543_v18  ;;  %v419_v4 = vld [vmem:[#allocation3 + $0x58] sm:$0x3] }
  0xd0   :  { %v380_v7 = vmul.f32 %v377_v34, %v1507_v45  ;;  %v388_v10 = vmul.f32 %v385_v33, %v1459_v21  ;;  %v396_v11 = vmul.f32 %v393_v35, %v1465_v24  ;;  %v404_v16 = vmul.f32 %v401_v36, %v1461_v22 }
  0xd1   :  { %v345_v9 = vld [vmem:[#allocation3 + $0x98] sm:$0x3]  ;;  %v412_v29 = vmul.f32 %v409_v32, %v1471_v26  ;;  %v420_v31 = vmul.f32 %v417_v38, %v1474_v28  ;;  %v365_v40 = vadd.f32 %v361_v58, %v359_v8  ;;  %v428_v43 = vmul.f32 %v425_v39, %v1468_v25 }
  0xd2   :  { %v347_v14 = vmul.f32 %v345_v9, %v343_v59  ;;  %v454_v41 = vadd.f32 %v380_v7, %v1513_v47  ;;  %v456_v42 = vadd.f32 %v396_v11, %v388_v10  ;;  %v381_v30 = vmul.f32 %v379_v61, %v377_v34  ;;  %v373_v11 = vld [vmem:[#allocation2 + $0x18] sm:$0x3]  ;;  %v1622_v61 = vpop.permute.xlu1 %1145 }
  0xd3   :  { %v458_v44 = vadd.f32 %v412_v29, %v404_v16  ;;  %v460_v59 = vadd.f32 %v428_v43, %v420_v31  ;;  %v389_v58 = vmul.f32 %v387_v62, %v385_v33  ;;  %v397_v47 = vmul.f32 %v395_v63, %v393_v35 }
  0xd4   :  { %v363_v57 = vadd.f32 %v357_v12, %v347_v14  ;;  %v464_v56 = vadd.f32 %v456_v42, %v454_v41  ;;  %v405_v6 = vmul.f32 %v403_v60, %v401_v36  ;;  %v413_v7 = vmul.f32 %v411_v3, %v409_v32  ;;  %v443_v36 = vld [vmem:[#allocation3 + $0x88] sm:$0x3]  ;;  %v451_v42 = vld [vmem:[#allocation3 + $0x98] sm:$0x3] }
  0xd5   :  { %v466_v46 = vadd.f32 %v460_v59, %v458_v44  ;;  %v421_v8 = vmul.f32 %v419_v4, %v417_v38  ;;  %v429_v9 = vmul.f32 %v427_v5, %v425_v39  ;;  %v433_v10 = vrot.slane %v1591_v1, %v1566_v37  ;;  %v1625_v4 = vpop.permute.xlu0 %1140 }
  0xd6   :  { %v367_v55 = vadd.f32 %v365_v40, %v363_v57  ;;  %v455_v12 = vadd.f32 %v381_v30, %v373_v11  ;;  %v457_v14 = vadd.f32 %v397_v47, %v389_v58  ;;  %v459_v16 = vadd.f32 %v413_v7, %v405_v6  ;;  %v435_v57 = vld [vmem:[#allocation3 + $0x78] sm:$0x3] }
  0xd7   :  { %v470_v2 = vadd.f32 %v466_v46, %v464_v56  ;;  %v461_v29 = vadd.f32 %v429_v9, %v421_v8  ;;  %v436_v33 = vmul.f32 %v433_v10, %v1575_v50  ;;  %v437_v35 = vmul.f32 %v435_v57, %v433_v10  ;;  %v509_v57 = vld [vmem:[#allocation3 + $0x38] sm:$0x3] }
  0xd8   :  { %1320 = vtanh.f32 %v367_v55  ;;  %v465_v39 = vadd.f32 %v457_v14, %v455_v12  ;;  %v1148_v58 = vmul.f32 %v1591_v1, %v1625_v4  ;;  %v485_v12 = vld [vmem:[#allocation3 + $0x8] sm:$0x3]  ;;  %v493_v14 = vld [vmem:[#allocation3 + $0x18] sm:$0x3] }
  0xd9   :  { %v467_v41 = vadd.f32 %v461_v29, %v459_v16 }
  0xdb   :  { %v471_v60 = vadd.f32 %v467_v41, %v465_v39 }
  0xe2   :  { %v1321_v31 = vpop.eup %1320 }
  0xe3   :  { %v441_v40 = vrot.slane %v1321_v31, %v1539_v15  ;;  %v449_v34 = vrot.slane %v1321_v31, %v1551_v27  ;;  %371 = vst [vmem:[#allocation2 + $0x8] sm:$0x3] %v1321_v31 }
  0xe5   :  { %v444_v32 = vmul.f32 %v441_v40, %v1585_v0  ;;  %v445_v38 = vmul.f32 %v443_v36, %v441_v40  ;;  %v452_v43 = vmul.f32 %v449_v34, %v1536_v13  ;;  %v453_v44 = vmul.f32 %v451_v42, %v449_v34  ;;  %v501_v40 = vld [vmem:[#allocation3 + $0x28] sm:$0x3] }
  0xe7   :  { %v462_v55 = vadd.f32 %v444_v32, %v436_v33  ;;  %v463_v56 = vadd.f32 %v445_v38, %v437_v35  ;;  %v517_v32 = vld [vmem:[#allocation3 + $0x48] sm:$0x3]  ;;  %v525_v38 = vld [vmem:[#allocation3 + $0x58] sm:$0x3] }
  0xe9   :  { %v468_v59 = vadd.f32 %v462_v55, %v452_v43  ;;  %v469_v46 = vadd.f32 %v463_v56, %v453_v44  ;;  %v533_v44 = vld [vmem:[#allocation3 + $0x68] sm:$0x3]  ;;  %v541_v55 = vld [vmem:[#allocation3 + $0x78] sm:$0x3] }
  0xea   :  { %v1123_v62 = vld [vmem:[#allocation2 + $0x8] sm:$0x3] }
  0xeb   :  { %v472_v63 = vadd.f32 %v470_v2, %v468_v59  ;;  %v473_v5 = vadd.f32 %v471_v60, %v469_v46  ;;  %v1149_v3 = vmul.f32 %v1622_v61, %v1123_v62  ;;  %v479_v62 = vld [vmem:[#allocation2 + $0x28] sm:$0x3] }
  0xed   :  { %1322 = vtanh.f32 %v472_v63  ;;  %v1165_v30 = vsel %vm1164_vm0, %v1149_v3, 0.0 }
  0xee   :  { %1324 = vtanh.f32 %v473_v5  ;;  %v1630_v47 = vadd.f32 %v1165_v30, %v1148_v58 }
  0xf0   :  { %v1167_v7 = vrot.slane %v1630_v47, 4 }
  0xf7   :  { %v1323_v6 = vpop.eup %1322 }
  0xf8   :  { %v1325_v8 = vpop.eup %1324  ;;  %v483_v2 = vrot.slane %v1323_v6, %v1539_v15  ;;  %v491_v9 = vrot.slane %v1323_v6, %v1551_v27  ;;  %v499_v10 = vrot.slane %v1323_v6, %v1541_v17  ;;  %v507_v11 = vrot.slane %v1323_v6, %v1547_v20 }
  0xf9   :  { %477 = vst [vmem:[#allocation2 + $0x18] sm:$0x3] %v1325_v8  ;;  %v515_v16 = vrot.slane %v1323_v6, %v1549_v23  ;;  %v523_v1 = vrot.slane %v1323_v6, %v1545_v19  ;;  %v531_v29 = vrot.slane %v1323_v6, %v1543_v18  ;;  %v539_v31 = vrot.slane %v1323_v6, %v1566_v37 }
  0xfa   :  { %v486_v34 = vmul.f32 %v483_v2, %v1507_v45  ;;  %v487_v33 = vmul.f32 %v485_v12, %v483_v2  ;;  %v494_v35 = vmul.f32 %v491_v9, %v1459_v21  ;;  %v495_v36 = vmul.f32 %v493_v14, %v491_v9 }
  0xfb   :  { %v502_v39 = vmul.f32 %v499_v10, %v1465_v24  ;;  %v503_v41 = vmul.f32 %v501_v40, %v499_v10  ;;  %v510_v42 = vmul.f32 %v507_v11, %v1461_v22  ;;  %v511_v43 = vmul.f32 %v509_v57, %v507_v11  ;;  %v549_v11 = vld [vmem:[#allocation3 + $0x88] sm:$0x3] }
  0xfc   :  { %v518_v56 = vmul.f32 %v515_v16, %v1471_v26  ;;  %v519_v59 = vmul.f32 %v517_v32, %v515_v16  ;;  %v526_v46 = vmul.f32 %v523_v1, %v1474_v28  ;;  %v527_v60 = vmul.f32 %v525_v38, %v523_v1  ;;  %v557_v38 = vld [vmem:[#allocation3 + $0x98] sm:$0x3] }
  0xfd   :  { %v534_v63 = vmul.f32 %v531_v29, %v1468_v25  ;;  %v535_v5 = vmul.f32 %v533_v44, %v531_v29  ;;  %v542_v3 = vmul.f32 %v539_v31, %v1575_v50  ;;  %v543_v30 = vmul.f32 %v541_v55, %v539_v31 }
  0xfe   :  { %v547_v58 = vrot.slane %v1325_v8, %v1539_v15  ;;  %v555_v2 = vrot.slane %v1325_v8, %v1551_v27  ;;  %v560_v9 = vadd.f32 %v486_v34, %v1516_v48  ;;  %v561_v10 = vadd.f32 %v487_v33, %v479_v62 }
  0xff   :  { %v562_v12 = vadd.f32 %v502_v39, %v494_v35  ;;  %v563_v14 = vadd.f32 %v503_v41, %v495_v36  ;;  %v564_v16 = vadd.f32 %v518_v56, %v510_v42  ;;  %v565_v57 = vadd.f32 %v519_v59, %v511_v43 }
 0x100   :  { %v550_v1 = vmul.f32 %v547_v58, %v1585_v0  ;;  %v551_v40 = vmul.f32 %v549_v11, %v547_v58  ;;  %v558_v29 = vmul.f32 %v555_v2, %v1536_v13  ;;  %v1125_v32 = vld [vmem:[#allocation2 + $0x18] sm:$0x3]  ;;  %v566_v31 = vadd.f32 %v534_v63, %v526_v46 }
 0x101   :  { %v567_v44 = vadd.f32 %v535_v5, %v527_v60  ;;  %v570_v55 = vadd.f32 %v562_v12, %v560_v9  ;;  %v571_v54 = vadd.f32 %v563_v14, %v561_v10  ;;  %v559_v8 = vmul.f32 %v557_v38, %v555_v2 }
 0x102   :  { %v568_v53 = vadd.f32 %v550_v1, %v542_v3  ;;  %v569_v48 = vadd.f32 %v551_v40, %v543_v30  ;;  %v1151_v34 = vmul.f32 %v1622_v61, %v1125_v32  ;;  %v572_v33 = vadd.f32 %v566_v31, %v564_v16  ;;  %v591_v1 = vld [vmem:[#allocation3 + $0x8] sm:$0x3]  ;;  %v599_v40 = vld [vmem:[#allocation3 + $0x18] sm:$0x3] }
 0x103   :  { %v573_v35 = vadd.f32 %v567_v44, %v565_v57  ;;  %v1150_v36 = vmul.f32 %v1323_v6, %v1625_v4  ;;  %v1168_v39 = vadd.f32 %v1167_v7, %v1630_v47  ;;  %v1658_v7 = vstv %s1285_s0  ;;  %v615_v44 = vld [vmem:[#allocation3 + $0x38] sm:$0x3] }
 0x104   :  { %v574_v41 = vadd.f32 %v568_v53, %v558_v29  ;;  %v575_v42 = vadd.f32 %v569_v48, %v559_v8  ;;  %v1173_v43 = vsel %vm1164_vm0, %v1151_v34, 0.0  ;;  %v576_v56 = vadd.f32 %v572_v33, %v570_v55  ;;  %v607_v55 = vld [vmem:[#allocation3 + $0x28] sm:$0x3] }
 0x105   :  { %v577_v59 = vadd.f32 %v573_v35, %v571_v54  ;;  %v1174_v46 = vadd.f32 %v1173_v43, %v1150_v36  ;;  %v1169_v5 = vrot.slane %v1168_v39, 2  ;;  %v623_v35 = vld [vmem:[#allocation3 + $0x48] sm:$0x3]  ;;  %v631_v36 = vld [vmem:[#allocation3 + $0x58] sm:$0x3] }
 0x106   :  { %v578_v60 = vadd.f32 %v576_v56, %v574_v41  ;;  %v639_v56 = vld [vmem:[#allocation3 + $0x68] sm:$0x3] }
 0x107   :  { %v579_v62 = vadd.f32 %v577_v59, %v575_v42  ;;  %v1175_v63 = vrot.slane %v1174_v46, 4  ;;  %v1170_v30 = vadd.f32 %v1169_v5, %v1168_v39  ;;  %v647_v59 = vld [vmem:[#allocation3 + $0x78] sm:$0x3] }
 0x108   :  { %1326 = vtanh.f32 %v578_v60  ;;  %v585_v5 = vld [vmem:[#allocation2 + $0x38] sm:$0x3] }
 0x109   :  { %v1176_v3 = vadd.f32 %v1175_v63, %v1174_v46  ;;  %1328 = vtanh.f32 %v579_v62  ;;  %v1171_v6 = vrot.slane %v1170_v30, 1 }
 0x10b   :  { %v1177_v58 = vrot.slane %v1176_v3, 2  ;;  %v1172_v54 = vadd.f32 %v1171_v6, %v1170_v30 }
 0x10d   :  { %v1178_v2 = vadd.f32 %v1177_v58, %v1176_v3 }
 0x10f   :  { %v1179_v47 = vrot.slane %v1178_v2, 1 }
 0x111   :  { %v1180_v53 = vadd.f32 %v1179_v47, %v1178_v2 }
 0x112   :  { %v1660_v9 = vpop.eup %1326 }
 0x113   :  { %v1663_v10 = vadd.f32 %v1658_v7, %v1180_v53  ;;  %v1329_v11 = vpop.eup %1328  ;;  %v589_v12 = vrot.slane %v1660_v9, %v1539_v15  ;;  %v597_v14 = vrot.slane %v1660_v9, %v1551_v27  ;;  %v605_v16 = vrot.slane %v1660_v9, %v1541_v17 }
 0x114   :  { %v613_v57 = vrot.slane %v1660_v9, %v1547_v20  ;;  %583 = vst [vmem:[#allocation2 + $0x28] sm:$0x3] %v1329_v11  ;;  %v621_v29 = vrot.slane %v1660_v9, %v1549_v23  ;;  %v629_v32 = vrot.slane %v1660_v9, %v1545_v19  ;;  %v637_v38 = vrot.slane %v1660_v9, %v1543_v18 }
 0x115   :  { %v645_v31 = vrot.slane %v1660_v9, %v1566_v37  ;;  %v592_v8 = vmul.f32 %v589_v12, %v1507_v45  ;;  %v593_v48 = vmul.f32 %v591_v1, %v589_v12  ;;  %v600_v34 = vmul.f32 %v597_v14, %v1459_v21 }
 0x116   :  { %v601_v33 = vmul.f32 %v599_v40, %v597_v14  ;;  %v608_v39 = vmul.f32 %v605_v16, %v1465_v24  ;;  %v609_v41 = vmul.f32 %v607_v55, %v605_v16  ;;  %v616_v42 = vmul.f32 %v613_v57, %v1461_v22  ;;  %v655_v14 = vld [vmem:[#allocation3 + $0x88] sm:$0x3]  ;;  %v663_v55 = vld [vmem:[#allocation3 + $0x98] sm:$0x3] }
 0x117   :  { %v617_v43 = vmul.f32 %v615_v44, %v613_v57  ;;  %v624_v46 = vmul.f32 %v621_v29, %v1471_v26  ;;  %v625_v60 = vmul.f32 %v623_v35, %v621_v29  ;;  %v632_v62 = vmul.f32 %v629_v32, %v1474_v28 }
 0x118   :  { %v633_v63 = vmul.f32 %v631_v36, %v629_v32  ;;  %v640_v3 = vmul.f32 %v637_v38, %v1468_v25  ;;  %v641_v30 = vmul.f32 %v639_v56, %v637_v38  ;;  %v648_v58 = vmul.f32 %v645_v31, %v1575_v50 }
 0x119   :  { %v649_v2 = vmul.f32 %v647_v59, %v645_v31  ;;  %v653_v6 = vrot.slane %v1329_v11, %v1539_v15  ;;  %v661_v47 = vrot.slane %v1329_v11, %v1551_v27  ;;  %v666_v53 = vadd.f32 %v592_v8, %v1519_v49 }
 0x11a   :  { %v667_v12 = vadd.f32 %v593_v48, %v585_v5  ;;  %v668_v16 = vadd.f32 %v608_v39, %v600_v34  ;;  %v669_v57 = vadd.f32 %v609_v41, %v601_v33  ;;  %v670_v1 = vadd.f32 %v624_v46, %v616_v42 }
 0x11b   :  { %v671_v40 = vadd.f32 %v625_v60, %v617_v43  ;;  %v656_v29 = vmul.f32 %v653_v6, %v1585_v0  ;;  %v657_v32 = vmul.f32 %v655_v14, %v653_v6  ;;  %v664_v38 = vmul.f32 %v661_v47, %v1536_v13  ;;  %v1127_v44 = vld [vmem:[#allocation2 + $0x28] sm:$0x3] }
 0x11c   :  { %v1230_v31 = vadd.f32 %v1658_v7, %v1172_v54  ;;  %v672_v35 = vadd.f32 %v640_v3, %v632_v62  ;;  %v673_v36 = vadd.f32 %v641_v30, %v633_v63  ;;  %v676_v11 = vadd.f32 %v668_v16, %v666_v53 }
 0x11d   :  { %v677_v56 = vadd.f32 %v669_v57, %v667_v12  ;;  %v665_v49 = vmul.f32 %v663_v55, %v661_v47  ;;  %v674_v8 = vadd.f32 %v656_v29, %v648_v58  ;;  %v675_v48 = vadd.f32 %v657_v32, %v649_v2  ;;  %v713_v55 = vld [vmem:[#allocation3 + $0x28] sm:$0x3] }
 0x11e   :  { %v1153_v34 = vmul.f32 %v1622_v61, %v1127_v44  ;;  %v678_v33 = vadd.f32 %v672_v35, %v670_v1  ;;  %v679_v39 = vadd.f32 %v673_v36, %v671_v40  ;;  %v1152_v41 = vmul.f32 %v1660_v9, %v1625_v4  ;;  %v697_v1 = vld [vmem:[#allocation3 + $0x8] sm:$0x3]  ;;  %v705_v40 = vld [vmem:[#allocation3 + $0x18] sm:$0x3] }
 0x11f   :  { %v1700_v42 = vsel %vm1246_vm1, %v1663_v10, %v1230_v31  ;;  %v680_v54 = vadd.f32 %v674_v8, %v664_v38  ;;  %v681_v43 = vadd.f32 %v675_v48, %v665_v49  ;;  %v721_v31 = vld [vmem:[#allocation3 + $0x38] sm:$0x3]  ;;  %v729_v49 = vld [vmem:[#allocation3 + $0x48] sm:$0x3] }
 0x120   :  { %v1181_v59 = vsel %vm1164_vm0, %v1153_v34, 0.0  ;;  %v682_v46 = vadd.f32 %v678_v33, %v676_v11  ;;  %v683_v60 = vadd.f32 %v679_v39, %v677_v56  ;;  %v737_v8 = vld [vmem:[#allocation3 + $0x58] sm:$0x3] }
 0x121   :  { %v1182_v62 = vadd.f32 %v1181_v59, %v1152_v41  ;;  %v745_v41 = vld [vmem:[#allocation3 + $0x68] sm:$0x3] }
 0x122   :  { %v684_v63 = vadd.f32 %v682_v46, %v680_v54  ;;  %v685_v5 = vadd.f32 %v683_v60, %v681_v43  ;;  %v753_v54 = vld [vmem:[#allocation3 + $0x78] sm:$0x3] }
 0x123   :  { %v1183_v3 = vrot.slane %v1182_v62, 4 }
 0x124   :  { %1330 = vtanh.f32 %v684_v63 }
 0x125   :  { %v1184_v30 = vadd.f32 %v1183_v3, %v1182_v62  ;;  %1332 = vtanh.f32 %v685_v5  ;;  %v691_v62 = vld [vmem:[#allocation2 + $0x48] sm:$0x3] }
 0x127   :  { %v1185_v58 = vrot.slane %v1184_v30, 2 }
 0x129   :  { %v1186_v2 = vadd.f32 %v1185_v58, %v1184_v30 }
 0x12b   :  { %v1187_v9 = vrot.slane %v1186_v2, 1 }
 0x12d   :  { %v1188_v6 = vadd.f32 %v1187_v9, %v1186_v2 }
 0x12e   :  { %v1331_v47 = vpop.eup %1330 }
 0x12f   :  { %v1704_v10 = vadd.f32 %v1658_v7, %v1188_v6  ;;  %v1333_v53 = vpop.eup %1332  ;;  %v695_v12 = vrot.slane %v1331_v47, %v1539_v15  ;;  %v703_v14 = vrot.slane %v1331_v47, %v1551_v27  ;;  %v711_v16 = vrot.slane %v1331_v47, %v1541_v17  ;;  %v761_v6 = vld [vmem:[#allocation3 + $0x88] sm:$0x3] }
 0x130   :  { %v719_v57 = vrot.slane %v1331_v47, %v1547_v20  ;;  %689 = vst [vmem:[#allocation2 + $0x38] sm:$0x3] %v1333_v53  ;;  %v727_v29 = vrot.slane %v1331_v47, %v1549_v23  ;;  %v735_v32 = vrot.slane %v1331_v47, %v1545_v19  ;;  %v743_v38 = vrot.slane %v1331_v47, %v1543_v18 }
 0x131   :  { %v751_v44 = vrot.slane %v1331_v47, %v1566_v37  ;;  %v698_v35 = vmul.f32 %v695_v12, %v1507_v45  ;;  %v699_v36 = vmul.f32 %v697_v1, %v695_v12  ;;  %v706_v11 = vmul.f32 %v703_v14, %v1459_v21 }
 0x132   :  { %v707_v56 = vmul.f32 %v705_v40, %v703_v14  ;;  %v714_v48 = vmul.f32 %v711_v16, %v1465_v24  ;;  %v715_v34 = vmul.f32 %v713_v55, %v711_v16  ;;  %v722_v33 = vmul.f32 %v719_v57, %v1461_v22 }
 0x133   :  { %v723_v39 = vmul.f32 %v721_v31, %v719_v57  ;;  %v730_v43 = vmul.f32 %v727_v29, %v1471_v26  ;;  %v731_v59 = vmul.f32 %v729_v49, %v727_v29  ;;  %v738_v46 = vmul.f32 %v735_v32, %v1474_v28 }
 0x134   :  { %v739_v60 = vmul.f32 %v737_v8, %v735_v32  ;;  %v746_v63 = vmul.f32 %v743_v38, %v1468_v25  ;;  %v747_v5 = vmul.f32 %v745_v41, %v743_v38  ;;  %v754_v3 = vmul.f32 %v751_v44, %v1575_v50  ;;  %v769_v32 = vld [vmem:[#allocation3 + $0x98] sm:$0x3] }
 0x135   :  { %v755_v30 = vmul.f32 %v753_v54, %v751_v44  ;;  %v759_v58 = vrot.slane %v1333_v53, %v1539_v15  ;;  %v767_v22 = vrot.slane %v1333_v53, %v1551_v27  ;;  %v772_v2 = vadd.f32 %v698_v35, %v1525_v51 }
 0x136   :  { %v773_v9 = vadd.f32 %v699_v36, %v691_v62  ;;  %v774_v12 = vadd.f32 %v714_v48, %v706_v11  ;;  %v775_v14 = vadd.f32 %v715_v34, %v707_v56  ;;  %v776_v16 = vadd.f32 %v730_v43, %v722_v33 }
 0x137   :  { %v777_v57 = vadd.f32 %v731_v59, %v723_v39  ;;  %v762_v1 = vmul.f32 %v759_v58, %v1585_v0  ;;  %v763_v40 = vmul.f32 %v761_v6, %v759_v58  ;;  %v770_v25 = vmul.f32 %v767_v22, %v1536_v13  ;;  %v1129_v29 = vld [vmem:[#allocation2 + $0x38] sm:$0x3] }
 0x138   :  { %v778_v38 = vadd.f32 %v746_v63, %v738_v46  ;;  %v779_v44 = vadd.f32 %v747_v5, %v739_v60  ;;  %v782_v31 = vadd.f32 %v774_v12, %v772_v2  ;;  %v783_v53 = vadd.f32 %v775_v14, %v773_v9  ;;  %v803_v9 = vld [vmem:[#allocation3 + $0x8] sm:$0x3]  ;;  %v811_v6 = vld [vmem:[#allocation3 + $0x18] sm:$0x3] }
 0x139   :  { %v771_v55 = vmul.f32 %v769_v32, %v767_v22  ;;  %v780_v51 = vadd.f32 %v762_v1, %v754_v3  ;;  %v781_v35 = vadd.f32 %v763_v40, %v755_v30  ;;  %v1155_v36 = vmul.f32 %v1622_v61, %v1129_v29  ;;  %v827_v1 = vld [vmem:[#allocation3 + $0x38] sm:$0x3]  ;;  %v819_v40 = vld [vmem:[#allocation3 + $0x28] sm:$0x3] }
 0x13a   :  { %v784_v11 = vadd.f32 %v778_v38, %v776_v16  ;;  %v785_v56 = vadd.f32 %v779_v44, %v777_v57  ;;  %v1154_v49 = vmul.f32 %v1331_v47, %v1625_v4  ;;  %v1731_v8 = vsel %vm1248_vm2, %v1704_v10, %v1700_v42  ;;  %v835_v44 = vld [vmem:[#allocation3 + $0x48] sm:$0x3] }
 0x13b   :  { %v786_v48 = vadd.f32 %v780_v51, %v770_v25  ;;  %v787_v34 = vadd.f32 %v781_v35, %v771_v55  ;;  %v1189_v33 = vsel %vm1164_vm0, %v1155_v36, 0.0  ;;  %v1758_v51 = vld [vmem:[#allocation3 + $0x30] sm:$0xff] }
 0x13c   :  { %v788_v39 = vadd.f32 %v784_v11, %v782_v31  ;;  %v789_v41 = vadd.f32 %v785_v56, %v783_v53  ;;  %v1190_v54 = vadd.f32 %v1189_v33, %v1154_v49  ;;  %v843_v31 = vld [vmem:[#allocation3 + $0x58] sm:$0x3]  ;;  %v851_v11 = vld [vmem:[#allocation3 + $0x68] sm:$0x3]  ;;  %v1763_v33 = vld [vmem:[#allocation3 + $0x60] sm:$0xff] }
 0x13d   :  { %v859_v56 = vld [vmem:[#allocation3 + $0x78] sm:$0x3] }
 0x13e   :  { %v790_v43 = vadd.f32 %v788_v39, %v786_v48  ;;  %v791_v59 = vadd.f32 %v789_v41, %v787_v34  ;;  %v1191_v46 = vrot.slane %v1190_v54, 4 }
 0x140   :  { %1334 = vtanh.f32 %v790_v43  ;;  %v1192_v60 = vadd.f32 %v1191_v46, %v1190_v54 }
 0x141   :  { %1336 = vtanh.f32 %v791_v59 }
 0x142   :  { %v1193_v62 = vrot.slane %v1192_v60, 2 }
 0x144   :  { %v1194_v63 = vadd.f32 %v1193_v62, %v1192_v60  ;;  %v867_v60 = vld [vmem:[#allocation3 + $0x88] sm:$0x3] }
 0x146   :  { %v1195_v47 = vrot.slane %v1194_v63, 1 }
 0x148   :  { %v1196_v5 = vadd.f32 %v1195_v47, %v1194_v63 }
 0x14a   :  { %v1734_v3 = vpop.eup %1334  ;;  %v1737_v42 = vadd.f32 %v1658_v7, %v1196_v5 }
 0x14b   :  { %v1337_v10 = vpop.eup %1336  ;;  %v801_v30 = vrot.slane %v1734_v3, %v1539_v15  ;;  %v809_v58 = vrot.slane %v1734_v3, %v1551_v27  ;;  %v817_v22 = vrot.slane %v1734_v3, %v1541_v17  ;;  %v825_v2 = vrot.slane %v1734_v3, %v1547_v20 }
 0x14c   :  { %795 = vst [vmem:[#allocation2 + $0x48] sm:$0x3] %v1337_v10  ;;  %v833_v12 = vrot.slane %v1734_v3, %v1549_v23  ;;  %v841_v14 = vrot.slane %v1734_v3, %v1545_v19  ;;  %v849_v16 = vrot.slane %v1734_v3, %v1543_v18  ;;  %v857_v57 = vrot.slane %v1734_v3, %v1566_v37 }
 0x14d   :  { %v804_v25 = vmul.f32 %v801_v30, %v1507_v45  ;;  %v805_v29 = vmul.f32 %v803_v9, %v801_v30  ;;  %v812_v32 = vmul.f32 %v809_v58, %v1459_v21  ;;  %v813_v38 = vmul.f32 %v811_v6, %v809_v58  ;;  %v797_v21 = vld [vmem:[#allocation2 + $0x58] sm:$0x3] }
 0x14e   :  { %v820_v53 = vmul.f32 %v817_v22, %v1465_v24  ;;  %v821_v55 = vmul.f32 %v819_v40, %v817_v22  ;;  %v828_v35 = vmul.f32 %v1758_v51, %v825_v2  ;;  %v829_v36 = vmul.f32 %v827_v1, %v825_v2  ;;  %v875_v2 = vld [vmem:[#allocation3 + $0x98] sm:$0x3] }
 0x14f   :  { %v836_v49 = vmul.f32 %v833_v12, %v1471_v26  ;;  %v837_v48 = vmul.f32 %v835_v44, %v833_v12  ;;  %v844_v45 = vmul.f32 %v841_v14, %v1474_v28  ;;  %v845_v34 = vmul.f32 %v843_v31, %v841_v14 }
 0x150   :  { %v852_v39 = vmul.f32 %v1763_v33, %v849_v16  ;;  %v853_v24 = vmul.f32 %v851_v11, %v849_v16  ;;  %v860_v41 = vmul.f32 %v857_v57, %v1575_v50  ;;  %v861_v54 = vmul.f32 %v859_v56, %v857_v57 }
 0x151   :  { %v865_v43 = vrot.slane %v1337_v10, %v1539_v15  ;;  %v873_v59 = vrot.slane %v1337_v10, %v1551_v27  ;;  %v878_v46 = vadd.f32 %v804_v25, %v1528_v52  ;;  %v879_v26 = vadd.f32 %v805_v29, %v797_v21 }
 0x152   :  { %v880_v62 = vadd.f32 %v820_v53, %v812_v32  ;;  %v881_v28 = vadd.f32 %v821_v55, %v813_v38  ;;  %v882_v63 = vadd.f32 %v836_v49, %v828_v35  ;;  %v883_v47 = vadd.f32 %v837_v48, %v829_v36 }
 0x153   :  { %v868_v5 = vmul.f32 %v865_v43, %v1585_v0  ;;  %v869_v30 = vmul.f32 %v867_v60, %v865_v43  ;;  %v876_v58 = vmul.f32 %v873_v59, %v1536_v13  ;;  %v1131_v22 = vld [vmem:[#allocation2 + $0x48] sm:$0x3]  ;;  %v884_v9 = vadd.f32 %v852_v39, %v844_v45  ;;  %v933_v60 = vld [vmem:[#allocation3 + $0x38] sm:$0x3] }
 0x154   :  { %v885_v6 = vadd.f32 %v853_v24, %v845_v34  ;;  %v888_v12 = vadd.f32 %v880_v62, %v878_v46  ;;  %v889_v10 = vadd.f32 %v881_v28, %v879_v26  ;;  %v877_v14 = vmul.f32 %v875_v2, %v873_v59  ;;  %v925_v62 = vld [vmem:[#allocation3 + $0x28] sm:$0x3]  ;;  %v1801_v28 = vld [vmem:[#allocation3] sm:$0xff]  ;;  %v949_v2 = vld [vmem:[#allocation3 + $0x58] sm:$0x3] }
 0x155   :  { %v886_v52 = vadd.f32 %v868_v5, %v860_v41  ;;  %v887_v16 = vadd.f32 %v869_v30, %v861_v54  ;;  %v1157_v57 = vmul.f32 %v1622_v61, %v1131_v22  ;;  %v890_v1 = vadd.f32 %v884_v9, %v882_v63  ;;  %v909_v41 = vld [vmem:[#allocation3 + $0x8] sm:$0x3]  ;;  %v917_v54 = vld [vmem:[#allocation3 + $0x18] sm:$0x3]  ;;  %v1804_v5 = vld [vmem:[#allocation3 + $0x10] sm:$0xff] }
 0x156   :  { %v891_v40 = vadd.f32 %v885_v6, %v883_v47  ;;  %v1156_v25 = vmul.f32 %v1734_v3, %v1625_v4  ;;  %v1777_v13 = vsel %vm1250_vm3, %v1737_v42, %v1731_v8  ;;  %v941_v22 = vld [vmem:[#allocation3 + $0x48] sm:$0x3]  ;;  %v1807_v9 = vld [vmem:[#allocation3 + $0x20] sm:$0xff] }
 0x157   :  { %v892_v29 = vadd.f32 %v886_v52, %v876_v58  ;;  %v893_v32 = vadd.f32 %v887_v16, %v877_v14  ;;  %v1197_v38 = vsel %vm1164_vm0, %v1157_v57, 0.0  ;;  %v894_v44 = vadd.f32 %v890_v1, %v888_v12  ;;  %v957_v52 = vld [vmem:[#allocation3 + $0x68] sm:$0x3]  ;;  %v965_v16 = vld [vmem:[#allocation3 + $0x78] sm:$0x3]  ;;  %v1811_v57 = vld [vmem:[#allocation3 + $0x40] sm:$0xff] }
 0x158   :  { %v895_v31 = vadd.f32 %v891_v40, %v889_v10  ;;  %v1198_v53 = vadd.f32 %v1197_v38, %v1156_v25  ;;  %v1814_v25 = vld [vmem:[#allocation3 + $0x50] sm:$0xff]  ;;  %v903_v38 = vld [vmem:[#allocation2 + $0x68] sm:$0x3] }
 0x159   :  { %v896_v55 = vadd.f32 %v894_v44, %v892_v29 }
 0x15a   :  { %v897_v35 = vadd.f32 %v895_v31, %v893_v32  ;;  %v1199_v36 = vrot.slane %v1198_v53, 4 }
 0x15b   :  { %1338 = vtanh.f32 %v896_v55 }
 0x15c   :  { %v1200_v11 = vadd.f32 %v1199_v36, %v1198_v53  ;;  %1340 = vtanh.f32 %v897_v35 }
 0x15e   :  { %v1201_v56 = vrot.slane %v1200_v11, 2 }
 0x160   :  { %v1202_v49 = vadd.f32 %v1201_v56, %v1200_v11  ;;  %v1898_v11 = vld [vmem:[#allocation9_spill] sm:$0xff] }
 0x162   :  { %v1203_v3 = vrot.slane %v1202_v49, 1 }
 0x164   :  { %v1204_v48 = vadd.f32 %v1203_v3, %v1202_v49  ;;  %v973_v3 = vld [vmem:[#allocation3 + $0x88] sm:$0x3] }
 0x165   :  { %v1780_v45 = vpop.eup %1338 }
 0x166   :  { %v1783_v8 = vadd.f32 %v1658_v7, %v1204_v48  ;;  %v1341_v42 = vpop.eup %1340  ;;  %v907_v34 = vrot.slane %v1780_v45, %v1539_v15  ;;  %v915_v21 = vrot.slane %v1780_v45, %v1551_v27  ;;  %v923_v39 = vrot.slane %v1780_v45, %v1541_v17 }
 0x167   :  { %v931_v24 = vrot.slane %v1780_v45, %v1547_v20  ;;  %901 = vst [vmem:[#allocation2 + $0x58] sm:$0x3] %v1341_v42  ;;  %v939_v43 = vrot.slane %v1780_v45, %v1549_v23  ;;  %v947_v59 = vrot.slane %v1780_v45, %v1545_v19  ;;  %v955_v46 = vrot.slane %v1780_v45, %v1543_v18 }
 0x168   :  { %v963_v26 = vrot.slane %v1780_v45, %v1566_v37  ;;  %v910_v63 = vmul.f32 %v1801_v28, %v907_v34  ;;  %v911_v47 = vmul.f32 %v909_v41, %v907_v34  ;;  %v918_v30 = vmul.f32 %v1804_v5, %v915_v21 }
 0x169   :  { %v919_v58 = vmul.f32 %v917_v54, %v915_v21  ;;  %v926_v6 = vmul.f32 %v1807_v9, %v923_v39  ;;  %v927_v12 = vmul.f32 %v925_v62, %v923_v39  ;;  %v934_v10 = vmul.f32 %v1758_v51, %v931_v24  ;;  %v1823_v54 = vld [vmem:[#allocation3 + $0x90] sm:$0xff] }
 0x16a   :  { %v935_v14 = vmul.f32 %v933_v60, %v931_v24  ;;  %v942_v1 = vmul.f32 %v1811_v57, %v939_v43  ;;  %v943_v40 = vmul.f32 %v941_v22, %v939_v43  ;;  %v950_v29 = vmul.f32 %v1814_v25, %v947_v59 }
 0x16b   :  { %v951_v32 = vmul.f32 %v949_v2, %v947_v59  ;;  %v958_v44 = vmul.f32 %v1763_v33, %v955_v46  ;;  %v959_v31 = vmul.f32 %v957_v52, %v955_v46  ;;  %v966_v53 = vmul.f32 %v963_v26, %v1575_v50  ;;  %v981_v59 = vld [vmem:[#allocation3 + $0x98] sm:$0x3] }
 0x16c   :  { %v967_v55 = vmul.f32 %v965_v16, %v963_v26  ;;  %v971_v35 = vrot.slane %v1341_v42, %v1539_v15  ;;  %v979_v36 = vrot.slane %v1341_v42, %v1551_v27  ;;  %v984_v56 = vadd.f32 %v910_v63, %v1898_v11 }
 0x16d   :  { %v985_v49 = vadd.f32 %v911_v47, %v903_v38  ;;  %v986_v48 = vadd.f32 %v926_v6, %v918_v30  ;;  %v987_v34 = vadd.f32 %v927_v12, %v919_v58  ;;  %v988_v21 = vadd.f32 %v942_v1, %v934_v10 }
 0x16e   :  { %v989_v39 = vadd.f32 %v943_v40, %v935_v14  ;;  %v974_v24 = vmul.f32 %v971_v35, %v1585_v0  ;;  %v975_v41 = vmul.f32 %v973_v3, %v971_v35  ;;  %v982_v50 = vmul.f32 %v1823_v54, %v979_v36  ;;  %v1133_v43 = vld [vmem:[#allocation2 + $0x58] sm:$0x3] }
 0x16f   :  { %v990_v46 = vadd.f32 %v958_v44, %v950_v29  ;;  %v991_v42 = vadd.f32 %v959_v31, %v951_v32  ;;  %v994_v26 = vadd.f32 %v986_v48, %v984_v56  ;;  %v995_v60 = vadd.f32 %v987_v34, %v985_v49  ;;  %v1015_v56 = vld [vmem:[#allocation3 + $0x8] sm:$0x3]  ;;  %v1023_v49 = vld [vmem:[#allocation3 + $0x18] sm:$0x3] }
 0x170   :  { %v983_v62 = vmul.f32 %v981_v59, %v979_v36  ;;  %v992_v63 = vadd.f32 %v974_v24, %v966_v53  ;;  %v993_v47 = vadd.f32 %v975_v41, %v967_v55  ;;  %v1159_v30 = vmul.f32 %v1622_v61, %v1133_v43  ;;  %v1047_v43 = vld [vmem:[#allocation3 + $0x48] sm:$0x3]  ;;  %v1055_v59 = vld [vmem:[#allocation3 + $0x58] sm:$0x3] }
 0x171   :  { %v996_v58 = vadd.f32 %v990_v46, %v988_v21  ;;  %v997_v22 = vadd.f32 %v991_v42, %v989_v39  ;;  %v1158_v0 = vmul.f32 %v1780_v45, %v1625_v4  ;;  %v1831_v2 = vsel %vm1252_vm4, %v1783_v8, %v1777_v13  ;;  %v1039_v39 = vld [vmem:[#allocation3 + $0x38] sm:$0x3] }
 0x172   :  { %v998_v6 = vadd.f32 %v992_v63, %v982_v50  ;;  %v999_v12 = vadd.f32 %v993_v47, %v983_v62  ;;  %v1205_v10 = vsel %vm1164_vm0, %v1159_v30, 0.0  ;;  %v1009_v63 = vld [vmem:[#allocation2 + $0x78] sm:$0x3]  ;;  %v1358_v30 = vld [vmem:[#allocation3 + $0x70] sm:$0xff] }
 0x173   :  { %v1000_v14 = vadd.f32 %v996_v58, %v994_v26  ;;  %v1001_v52 = vadd.f32 %v997_v22, %v995_v60  ;;  %v1206_v16 = vadd.f32 %v1205_v10, %v1158_v0  ;;  %v1071_v26 = vld [vmem:[#allocation3 + $0x78] sm:$0x3]  ;;  %v1899_v0 = vld [vmem:[#allocation10_spill] sm:$0xff] }
 0x174   :  { %v1079_v10 = vld [vmem:[#allocation3 + $0x88] sm:$0x3] }
 0x175   :  { %v1002_v1 = vadd.f32 %v1000_v14, %v998_v6  ;;  %v1003_v40 = vadd.f32 %v1001_v52, %v999_v12  ;;  %v1207_v29 = vrot.slane %v1206_v16, 4 }
 0x177   :  { %1342 = vtanh.f32 %v1002_v1  ;;  %v1208_v32 = vadd.f32 %v1207_v29, %v1206_v16  ;;  %v1359_v16 = vld [vmem:[#allocation3 + $0x80] sm:$0xff] }
 0x178   :  { %1344 = vtanh.f32 %v1003_v40 }
 0x179   :  { %v1209_v38 = vrot.slane %v1208_v32, 2 }
 0x17b   :  { %v1210_v44 = vadd.f32 %v1209_v38, %v1208_v32  ;;  %v1087_v32 = vld [vmem:[#allocation3 + $0x98] sm:$0x3] }
 0x17d   :  { %v1211_v45 = vrot.slane %v1210_v44, 1 }
 0x17f   :  { %v1212_v31 = vadd.f32 %v1211_v45, %v1210_v44 }
 0x181   :  { %v1834_v53 = vpop.eup %1342  ;;  %v1837_v13 = vadd.f32 %v1658_v7, %v1212_v31 }
 0x182   :  { %v1345_v8 = vpop.eup %1344  ;;  %v1013_v55 = vrot.slane %v1834_v53, %v1539_v15  ;;  %v1021_v35 = vrot.slane %v1834_v53, %v1551_v27  ;;  %v1029_v36 = vrot.slane %v1834_v53, %v1541_v17  ;;  %v1037_v11 = vrot.slane %v1834_v53, %v1547_v20  ;;  %v1031_v17 = vld [vmem:[#allocation3 + $0x28] sm:$0x3] }
 0x183   :  { %1007 = vst [vmem:[#allocation2 + $0x68] sm:$0x3] %v1345_v8  ;;  %v1045_v3 = vrot.slane %v1834_v53, %v1549_v23  ;;  %v1053_v48 = vrot.slane %v1834_v53, %v1545_v19  ;;  %v1061_v34 = vrot.slane %v1834_v53, %v1543_v18  ;;  %v1069_v21 = vrot.slane %v1834_v53, %v1566_v37  ;;  %v1063_v18 = vld [vmem:[#allocation3 + $0x68] sm:$0x3] }
 0x184   :  { %v1016_v24 = vmul.f32 %v1801_v28, %v1013_v55  ;;  %v1017_v20 = vmul.f32 %v1015_v56, %v1013_v55  ;;  %v1024_v41 = vmul.f32 %v1804_v5, %v1021_v35  ;;  %v1025_v50 = vmul.f32 %v1023_v49, %v1021_v35 }
 0x185   :  { %v1032_v23 = vmul.f32 %v1807_v9, %v1029_v36  ;;  %v1033_v46 = vmul.f32 %v1031_v17, %v1029_v36  ;;  %v1040_v19 = vmul.f32 %v1758_v51, %v1037_v11  ;;  %v1041_v42 = vmul.f32 %v1039_v39, %v1037_v11 }
 0x186   :  { %v1048_v37 = vmul.f32 %v1811_v57, %v1045_v3  ;;  %v1049_v60 = vmul.f32 %v1047_v43, %v1045_v3  ;;  %v1056_v62 = vmul.f32 %v1814_v25, %v1053_v48  ;;  %v1057_v28 = vmul.f32 %v1055_v59, %v1053_v48 }
 0x187   :  { %v1064_v5 = vmul.f32 %v1763_v33, %v1061_v34  ;;  %v1065_v47 = vmul.f32 %v1063_v18, %v1061_v34  ;;  %v1072_v58 = vmul.f32 %v1358_v30, %v1069_v21  ;;  %v1073_v22 = vmul.f32 %v1071_v26, %v1069_v21 }
 0x188   :  { %v1077_v9 = vrot.slane %v1345_v8, %v1539_v15  ;;  %v1085_v51 = vrot.slane %v1345_v8, %v1551_v27  ;;  %v1090_v6 = vadd.f32 %v1016_v24, %v1899_v0  ;;  %v1091_v12 = vadd.f32 %v1017_v20, %v1009_v63 }
 0x189   :  { %v1092_v57 = vadd.f32 %v1032_v23, %v1024_v41  ;;  %v1093_v14 = vadd.f32 %v1033_v46, %v1025_v50  ;;  %v1094_v52 = vadd.f32 %v1048_v37, %v1040_v19  ;;  %v1095_v25 = vadd.f32 %v1049_v60, %v1041_v42 }
 0x18a   :  { %v1080_v1 = vmul.f32 %v1359_v16, %v1077_v9  ;;  %v1081_v40 = vmul.f32 %v1079_v10, %v1077_v9  ;;  %v1088_v33 = vmul.f32 %v1823_v54, %v1085_v51  ;;  %v1135_v29 = vld [vmem:[#allocation2 + $0x68] sm:$0x3]  ;;  %v1096_v38 = vadd.f32 %v1064_v5, %v1056_v62 }
 0x18b   :  { %v1097_v15 = vadd.f32 %v1065_v47, %v1057_v28  ;;  %v1100_v44 = vadd.f32 %v1092_v57, %v1090_v6  ;;  %v1101_v27 = vadd.f32 %v1093_v14, %v1091_v12  ;;  %v1089_v45 = vmul.f32 %v1087_v32, %v1085_v51 }
 0x18c   :  { %v1098_v31 = vadd.f32 %v1080_v1, %v1072_v58  ;;  %v1099_v8 = vadd.f32 %v1081_v40, %v1073_v22  ;;  %v1161_v55 = vmul.f32 %v1622_v61, %v1135_v29  ;;  %v1102_v35 = vadd.f32 %v1096_v38, %v1094_v52 }
 0x18d   :  { %v1103_v36 = vadd.f32 %v1097_v15, %v1095_v25  ;;  %v1160_v11 = vmul.f32 %v1834_v53, %v1625_v4  ;;  %v1255_v54 = vsel %vm1254_vm5, %v1837_v13, %v1831_v2 }
 0x18e   :  { %v1104_v56 = vadd.f32 %v1098_v31, %v1088_v33  ;;  %v1105_v49 = vadd.f32 %v1099_v8, %v1089_v45  ;;  %v1213_v3 = vsel %vm1164_vm0, %v1161_v55, 0.0  ;;  %v1106_v48 = vadd.f32 %v1102_v35, %v1100_v44 }
 0x18f   :  { %v1107_v34 = vadd.f32 %v1103_v36, %v1101_v27  ;;  %v1214_v21 = vadd.f32 %v1213_v3, %v1160_v11 }
 0x190   :  { %v1108_v39 = vadd.f32 %v1106_v48, %v1104_v56 }
 0x191   :  { %v1109_v17 = vadd.f32 %v1107_v34, %v1105_v49  ;;  %v1215_v24 = vrot.slane %v1214_v21, 4 }
 0x192   :  { %1346 = vtanh.f32 %v1108_v39 }
 0x193   :  { %v1216_v20 = vadd.f32 %v1215_v24, %v1214_v21  ;;  %1348 = vtanh.f32 %v1109_v17 }
 0x195   :  { %v1217_v41 = vrot.slane %v1216_v20, 2 }
 0x197   :  { %v1218_v50 = vadd.f32 %v1217_v41, %v1216_v20 }
 0x199   :  { %v1219_v43 = vrot.slane %v1218_v50, 1 }
 0x19b   :  { %v1220_v53 = vadd.f32 %v1219_v43, %v1218_v50 }
 0x19c   :  { %v1347_v59 = vpop.eup %1346 }
 0x19d   :  { %v1236_v2 = vadd.f32 %v1658_v7, %v1220_v53  ;;  %v1349_v13 = vpop.eup %1348  ;;  %v1162_v42 = vmul.f32 %v1347_v59, %v1625_v4 }
 0x19e   :  { %1113 = vst [vmem:[#allocation2 + $0x78] sm:$0x3] %v1349_v13  ;;  %1115 = vst [vmem:[#allocation4 + $0x8] sm:$0x3] %v1349_v13 }
 0x19f   :  { %v1257_v23 = vsel %vm1256_vm6, %v1236_v2, %v1255_v54 }
 0x1a5   :  { %v1137_v46 = vld [vmem:[#allocation2 + $0x78] sm:$0x3] }
 0x1a6   :  { %v1163_v19 = vmul.f32 %v1622_v61, %v1137_v46 }
 0x1a8   :  { %v1221_v18 = vsel %vm1164_vm0, %v1163_v19, 0.0 }
 0x1a9   :  { %v1222_v26 = vadd.f32 %v1221_v18, %v1162_v42 }
 0x1ab   :  { %v1223_v37 = vrot.slane %v1222_v26, 4 }
 0x1ad   :  { %v1224_v60 = vadd.f32 %v1223_v37, %v1222_v26 }
 0x1af   :  { %v1225_v62 = vrot.slane %v1224_v60, 2 }
 0x1b1   :  { %v1226_v28 = vadd.f32 %v1225_v62, %v1224_v60 }
 0x1b3   :  { %v1227_v63 = vrot.slane %v1226_v28, 1 }
 0x1b5   :  { %v1228_v5 = vadd.f32 %v1227_v63, %v1226_v28 }
 0x1b7   :  { %v1237_v47 = vadd.f32 %v1658_v7, %v1228_v5 }
 0x1b9   :  { %v1259_v30 = vsel %vm1258_vm7, %v1237_v47, %v1257_v23 }
 0x1ba   :  { %1261 = vst [vmem:[#allocation6] sm:$0xff] %v1259_v30 }
 0x1bb   :  { %1371 = shalt.err (!%p1368_p4)
}
 0x1bc   :  { %s1372_s29 = scalar_lea.hbm %s1895_s6, 128 }
 0x1bd   :  { %p1373_p5 = scmp.ne.s32.totalorder %s1895_s6, %s1372_s29  ;;  %p1376_p6 = scmp.lt.u32.totalorder %s1372_s29, %s1895_s6 }
 0x1bf   :  { %p1378_p7 = pnand %p1376_p6, %p1373_p5 }
 0x1c1   :  { %1381 = shalt.err (!%p1378_p7)
}
 0x1c2   :  { %1271 = dma.vmem_to_hbm [thread:$0]  %s1269_s5, 128, %s1895_s6, [#allocation7]  }
 0x1c3   :  { %1382 = dma.done.wait [#allocation7], 128  }
 0x1c4   :  { %1383 = vsyncadd [#allocation7], 4294967168 }
 0x1c5   :  { %1275 = vsyncpa [#allocation7], 1 }

</bundles_post_ra>
